<compile_context>
chip_gen: v5e
topology: v5e:2x2
jax: 0.10.0
libtpu: 0.0.40
codegen_flags: <defaults>
</compile_context>

<pallas_src>
import jax
import jax.numpy as jnp
from jax import lax
from jax.experimental import pallas as pl
from jax.experimental.pallas import tpu as pltpu


# ----------------------------- helpers ----------------------------------------
def _vmem_capacity_bytes():
    try:
        return int(pltpu.get_tpu_info().vmem_capacity_bytes)
    except Exception:
        return 64 * 1024 * 1024  # conservative default (v7x per-TensorCore VMEM)


# ----------------------------- Pallas kernel ----------------------------------
def _make_kernel(P, kw, W, M):
    """Direct conv: accumulate the P = kh*kw shifted taps as fused (2Cin x 2Cout) GEMMs."""

    def kernel(x_ref, w_ref, b_ref, o_ref):
        # x_ref: (1, 1, TH*W, 2Cin)  row-major flattened input rows (incl. halo rows)
        # w_ref: (P, 2Cin, 2Cout)    per-tap fused weights  [[wr | wi], [-wi | wr]]
        # b_ref: (1, 2Cout)          fused bias [br - bi | br + bi]
        # o_ref: (1, 1, M, 2Cout)    M = TOH*W; columns [real | imag]
        acc = jnp.zeros((M, o_ref.shape[-1]), jnp.float32)
        for p in range(P):
            i, j = divmod(p, kw)
            # Row m = r*W + c of this slice holds x[tile_row r + i, col c + j, :].
            # Columns c >= OW wrap into the next image row -> garbage, sliced off by
            # the wrapper (costs only W/OW ~ 1.1x output bytes instead of a 16x pad).
            lhs = x_ref[0, 0, pl.ds(i * W + j, M), :]
            acc = acc + jnp.dot(lhs, w_ref[p], preferred_element_type=jnp.float32)
        o_ref[0, 0] = (acc + b_ref[...]).astype(o_ref.dtype)

    return kernel


# ------------------------------ JAX wrapper ------------------------------------
def complex_conv2d(x, w_r, b_r, w_i, b_i, *, target_tile_bytes=2 << 20, use_bf16=False):
    """x: (B, Cin, H, W) complex64; w_*: (Cout, Cin, kh, kw) f32; b_*: (Cout,) f32.
    Returns (B, Cout, OH, OW) complex64 (stride=1, padding=0, dilation=1, groups=1)."""
    B, Cin, H, W = x.shape
    Cout, Cin_w, kh, kw = w_r.shape
    assert Cin_w == Cin and w_i.shape == w_r.shape and H >= kh and W >= kw
    OH, OW = H - kh + 1, W - kw + 1
    P = kh * kw
    C2in, C2out = 2 * Cin, 2 * Cout

    # Optional bf16 streaming (halves HBM read traffic; accumulation stays f32).
    cdtype = jnp.bfloat16 if use_bf16 else jnp.float32
    isz = jnp.dtype(cdtype).itemsize

    xr = jnp.real(x).astype(jnp.float32)
    xi = jnp.imag(x).astype(jnp.float32)
    # NHWC with [real-channels | imag-channels] on the contraction (last) axis.
    x_nhwc = jnp.concatenate(
        [jnp.transpose(xr, (0, 2, 3, 1)), jnp.transpose(xi, (0, 2, 3, 1))],
        axis=-1).astype(cdtype)                                        # (B, H, W, 2Cin)

    # ---- row tiling: TOH output rows per grid step, kh halo rows (the extra row keeps
    #      the bottom-right tap's flattened read in bounds). ----
    row_bytes = W * C2in * isz
    TOH = max(1, min(OH, target_tile_bytes // max(row_bytes, 1) - kh))
    if B == 1 and TOH >= OH and OH > 1:           # guarantee >= 2 grid steps (megacore)
        TOH = (OH + 1) // 2
    T = -(-OH // TOH)
    TH = TOH + kh
    M = TOH * W

    # ---- halo'd row tiles: only kh rows per tile are duplicated (for T == 1 this is
    #      just the image plus one zero row) -> ~1.1-1.3x input bytes vs 9x im2col. ----
    rows_needed = T * TOH + kh
    x_pad = jnp.pad(x_nhwc, ((0, 0), (0, rows_needed - H), (0, 0), (0, 0)))
    row_idx = jnp.arange(T)[:, None] * TOH + jnp.arange(TH)[None, :]   # (T, TH)
    x_tiles = x_pad[:, row_idx].reshape(B, T, TH * W, C2in)

    # ---- fused per-tap weights: contraction rows [xr | xi] -> output cols [real | imag]
    wr_t = jnp.transpose(w_r, (2, 3, 1, 0)).reshape(P, Cin, Cout).astype(jnp.float32)
    wi_t = jnp.transpose(w_i, (2, 3, 1, 0)).reshape(P, Cin, Cout).astype(jnp.float32)
    w_cat = jnp.concatenate(
        [jnp.concatenate([wr_t, wi_t], axis=2),        # xr rows -> [ wr | wi]
         jnp.concatenate([-wi_t, wr_t], axis=2)],      # xi rows -> [-wi | wr]
        axis=1).astype(cdtype)                          # (P, 2Cin, 2Cout)
    b_cat = jnp.concatenate([b_r - b_i, b_r + b_i]).astype(jnp.float32).reshape(1, C2out)

    kernel = _make_kernel(P, kw, W, M)

    # ---- generation-aware VMEM budget: 2x (double-buffered) in/out tiles + 2x resident
    #      weights/bias + slack for compute temporaries. ----
    est = 2 * (TH * W * C2in * isz + M * C2out * 4 + P * C2in * C2out * isz + C2out * 8)
    est += TH * W * C2in * isz + M * C2out * 4
    vmem_cap = _vmem_capacity_bytes()
    vmem_limit = min(max(est + (4 << 20), 32 << 20), int(0.75 * vmem_cap))

    out = pl.pallas_call(
        kernel,
        out_shape=jax.ShapeDtypeStruct((B, T, M, C2out), jnp.float32),
        grid=(B, T),
        in_specs=[
            pl.BlockSpec((1, 1, TH * W, C2in), lambda b, t: (b, t, 0, 0)),  # row tile
            pl.BlockSpec((P, C2in, C2out), lambda b, t: (0, 0, 0)),         # resident W
            pl.BlockSpec((1, C2out), lambda b, t: (0, 0)),                  # resident b
        ],
        out_specs=pl.BlockSpec((1, 1, M, C2out), lambda b, t: (b, t, 0, 0)),
        compiler_params=pltpu.CompilerParams(
            dimension_semantics=("parallel", "parallel"),
            vmem_limit_bytes=vmem_limit),
    )(x_tiles, w_cat, b_cat)

    # valid region: first OH rows (last tile may include padded rows), first OW columns
    out = out.reshape(B, T * TOH, W, C2out)[:, :OH, :OW, :]
    out_c = lax.complex(out[..., :Cout], out[..., Cout:]).astype(jnp.complex64)
    return jnp.transpose(out_c, (0, 3, 1, 2))                          # NCHW


# ------------------------------ reference -------------------------------------
def _conv2d_ref(x, w, b):
    y = lax.conv_general_dilated(
        x, w, window_strides=(1, 1), padding="VALID",
        dimension_numbers=("NCHW", "OIHW", "NCHW"))
    return y + b[None, :, None, None]


def complex_conv2d_ref(x, w_r, b_r, w_i, b_i):
    xr = jnp.real(x).astype(jnp.float32)
    xi = jnp.imag(x).astype(jnp.float32)
    real = _conv2d_ref(xr, w_r, b_r) - _conv2d_ref(xi, w_i, b_i)
    imag = _conv2d_ref(xi, w_r, b_r) + _conv2d_ref(xr, w_i, b_i)
    return (real + 1j * imag).astype(jnp.complex64)


# -------------------------------- main -----------------------------------------
if __name__ == "__main__":
    B, Cin, Cout, H, W, ksize = 2, 4, 8, 16, 16, 3

    key = jax.random.PRNGKey(0)
    k1, k2, k3, k4, k5, k6 = jax.random.split(key, 6)

    w_r = 0.1 * jax.random.normal(k1, (Cout, Cin, ksize, ksize), jnp.float32)
    b_r = 0.1 * jax.random.normal(k2, (Cout,), jnp.float32)
    w_i = 0.1 * jax.random.normal(k3, (Cout, Cin, ksize, ksize), jnp.float32)
    b_i = 0.1 * jax.random.normal(k4, (Cout,), jnp.float32)

    x_real = jax.random.normal(k5, (B, Cin, H, W), jnp.float32)
    x_imag = jax.random.normal(k6, (B, Cin, H, W), jnp.float32)
    x = (x_real + 1j * x_imag).astype(jnp.complex64)

    conv = jax.jit(complex_conv2d)
    out = jax.block_until_ready(conv(x, w_r, b_r, w_i, b_i))
    ref = jax.block_until_ready(complex_conv2d_ref(x, w_r, b_r, w_i, b_i))

    assert out.shape == (B, Cout, H - ksize + 1, W - ksize + 1), out.shape
    assert out.dtype == jnp.complex64, out.dtype
    assert jnp.allclose(out, ref, atol=1e-4, rtol=1e-4), "mismatch vs reference"

    print("KERNEL_OK")
</pallas_src>

<mosaic_0001>
module attributes {stable_mosaic.version = 11 : i64} {
  func.func @kernel(%arg0: i32, %arg1: i32, %arg2: memref<1x1x272x8xf32, #tpu.memory_space<vmem>>, %arg3: memref<9x8x16xf32, #tpu.memory_space<vmem>>, %arg4: memref<1x16xf32, #tpu.memory_space<vmem>>, %arg5: memref<1x1x224x16xf32, #tpu.memory_space<vmem>>) attributes {dimension_semantics = [#tpu.dimension_semantics<parallel>, #tpu.dimension_semantics<parallel>], iteration_bounds = array<i64: 2, 1>, scalar_prefetch = 0 : i64, scratch_operands = 0 : i64, tpu.core_type = #tpu.core_type<tc>, window_params = [{transform_indices = @transform_0, window_bounds = array<i64: 1, 1, 272, 8>}, {pipeline_mode = #tpu.pipeline_mode<synchronous>, transform_indices = @transform_1, window_bounds = array<i64: 9, 8, 16>}, {pipeline_mode = #tpu.pipeline_mode<synchronous>, transform_indices = @transform_2, window_bounds = array<i64: 1, 16>}, {transform_indices = @transform_3, window_bounds = array<i64: 1, 1, 224, 16>}]} {
    %cst = arith.constant 0.000000e+00 : f32
    %0 = vector.broadcast %cst : f32 to vector<224x16xf32>
    %c0 = arith.constant 0 : index
    %c0_0 = arith.constant 0 : index
    %c0_1 = arith.constant 0 : index
    %c0_2 = arith.constant 0 : index
    %1 = vector.load %arg2[%c0, %c0_0, %c0_1, %c0_2] : memref<1x1x272x8xf32, #tpu.memory_space<vmem>>, vector<1x1x224x8xf32>
    %2 = vector.shape_cast %1 : vector<1x1x224x8xf32> to vector<224x8xf32>
    %c0_3 = arith.constant 0 : index
    %c0_4 = arith.constant 0 : index
    %c0_5 = arith.constant 0 : index
    %3 = vector.load %arg3[%c0_3, %c0_4, %c0_5] : memref<9x8x16xf32, #tpu.memory_space<vmem>>, vector<1x8x16xf32>
    %4 = vector.shape_cast %3 : vector<1x8x16xf32> to vector<8x16xf32>
    %cst_6 = arith.constant dense<0.000000e+00> : vector<224x16xf32>
    %5 = tpu.matmul %2, %4, %cst_6 {dimension_numbers = #tpu.dot_dimension_numbers<[1], [0], [0], [1], [0, 0, 1, 1], [], []>} : vector<224x8xf32>, vector<8x16xf32>, vector<224x16xf32> -> vector<224x16xf32>
    %6 = arith.addf %0, %5 : vector<224x16xf32>
    %c0_7 = arith.constant 0 : index
    %c0_8 = arith.constant 0 : index
    %c1 = arith.constant 1 : index
    %c0_9 = arith.constant 0 : index
    %7 = vector.load %arg2[%c0_7, %c0_8, %c1, %c0_9] : memref<1x1x272x8xf32, #tpu.memory_space<vmem>>, vector<1x1x224x8xf32>
    %8 = vector.shape_cast %7 : vector<1x1x224x8xf32> to vector<224x8xf32>
    %c1_10 = arith.constant 1 : index
    %c0_11 = arith.constant 0 : index
    %c0_12 = arith.constant 0 : index
    %9 = vector.load %arg3[%c1_10, %c0_11, %c0_12] : memref<9x8x16xf32, #tpu.memory_space<vmem>>, vector<1x8x16xf32>
    %10 = vector.shape_cast %9 : vector<1x8x16xf32> to vector<8x16xf32>
    %cst_13 = arith.constant dense<0.000000e+00> : vector<224x16xf32>
    %11 = tpu.matmul %8, %10, %cst_13 {dimension_numbers = #tpu.dot_dimension_numbers<[1], [0], [0], [1], [0, 0, 1, 1], [], []>} : vector<224x8xf32>, vector<8x16xf32>, vector<224x16xf32> -> vector<224x16xf32>
    %12 = arith.addf %6, %11 : vector<224x16xf32>
    %c0_14 = arith.constant 0 : index
    %c0_15 = arith.constant 0 : index
    %c2 = arith.constant 2 : index
    %c0_16 = arith.constant 0 : index
    %13 = vector.load %arg2[%c0_14, %c0_15, %c2, %c0_16] : memref<1x1x272x8xf32, #tpu.memory_space<vmem>>, vector<1x1x224x8xf32>
    %14 = vector.shape_cast %13 : vector<1x1x224x8xf32> to vector<224x8xf32>
    %c2_17 = arith.constant 2 : index
    %c0_18 = arith.constant 0 : index
    %c0_19 = arith.constant 0 : index
    %15 = vector.load %arg3[%c2_17, %c0_18, %c0_19] : memref<9x8x16xf32, #tpu.memory_space<vmem>>, vector<1x8x16xf32>
    %16 = vector.shape_cast %15 : vector<1x8x16xf32> to vector<8x16xf32>
    %cst_20 = arith.constant dense<0.000000e+00> : vector<224x16xf32>
    %17 = tpu.matmul %14, %16, %cst_20 {dimension_numbers = #tpu.dot_dimension_numbers<[1], [0], [0], [1], [0, 0, 1, 1], [], []>} : vector<224x8xf32>, vector<8x16xf32>, vector<224x16xf32> -> vector<224x16xf32>
    %18 = arith.addf %12, %17 : vector<224x16xf32>
    %c0_21 = arith.constant 0 : index
    %c0_22 = arith.constant 0 : index
    %c16 = arith.constant 16 : index
    %c0_23 = arith.constant 0 : index
    %19 = vector.load %arg2[%c0_21, %c0_22, %c16, %c0_23] : memref<1x1x272x8xf32, #tpu.memory_space<vmem>>, vector<1x1x224x8xf32>
    %20 = vector.shape_cast %19 : vector<1x1x224x8xf32> to vector<224x8xf32>
    %c3 = arith.constant 3 : index
    %c0_24 = arith.constant 0 : index
    %c0_25 = arith.constant 0 : index
    %21 = vector.load %arg3[%c3, %c0_24, %c0_25] : memref<9x8x16xf32, #tpu.memory_space<vmem>>, vector<1x8x16xf32>
    %22 = vector.shape_cast %21 : vector<1x8x16xf32> to vector<8x16xf32>
    %cst_26 = arith.constant dense<0.000000e+00> : vector<224x16xf32>
    %23 = tpu.matmul %20, %22, %cst_26 {dimension_numbers = #tpu.dot_dimension_numbers<[1], [0], [0], [1], [0, 0, 1, 1], [], []>} : vector<224x8xf32>, vector<8x16xf32>, vector<224x16xf32> -> vector<224x16xf32>
    %24 = arith.addf %18, %23 : vector<224x16xf32>
    %c0_27 = arith.constant 0 : index
    %c0_28 = arith.constant 0 : index
    %c17 = arith.constant 17 : index
    %c0_29 = arith.constant 0 : index
    %25 = vector.load %arg2[%c0_27, %c0_28, %c17, %c0_29] : memref<1x1x272x8xf32, #tpu.memory_space<vmem>>, vector<1x1x224x8xf32>
    %26 = vector.shape_cast %25 : vector<1x1x224x8xf32> to vector<224x8xf32>
    %c4 = arith.constant 4 : index
    %c0_30 = arith.constant 0 : index
    %c0_31 = arith.constant 0 : index
    %27 = vector.load %arg3[%c4, %c0_30, %c0_31] : memref<9x8x16xf32, #tpu.memory_space<vmem>>, vector<1x8x16xf32>
    %28 = vector.shape_cast %27 : vector<1x8x16xf32> to vector<8x16xf32>
    %cst_32 = arith.constant dense<0.000000e+00> : vector<224x16xf32>
    %29 = tpu.matmul %26, %28, %cst_32 {dimension_numbers = #tpu.dot_dimension_numbers<[1], [0], [0], [1], [0, 0, 1, 1], [], []>} : vector<224x8xf32>, vector<8x16xf32>, vector<224x16xf32> -> vector<224x16xf32>
    %30 = arith.addf %24, %29 : vector<224x16xf32>
    %c0_33 = arith.constant 0 : index
    %c0_34 = arith.constant 0 : index
    %c18 = arith.constant 18 : index
    %c0_35 = arith.constant 0 : index
    %31 = vector.load %arg2[%c0_33, %c0_34, %c18, %c0_35] : memref<1x1x272x8xf32, #tpu.memory_space<vmem>>, vector<1x1x224x8xf32>
    %32 = vector.shape_cast %31 : vector<1x1x224x8xf32> to vector<224x8xf32>
    %c5 = arith.constant 5 : index
    %c0_36 = arith.constant 0 : index
    %c0_37 = arith.constant 0 : index
    %33 = vector.load %arg3[%c5, %c0_36, %c0_37] : memref<9x8x16xf32, #tpu.memory_space<vmem>>, vector<1x8x16xf32>
    %34 = vector.shape_cast %33 : vector<1x8x16xf32> to vector<8x16xf32>
    %cst_38 = arith.constant dense<0.000000e+00> : vector<224x16xf32>
    %35 = tpu.matmul %32, %34, %cst_38 {dimension_numbers = #tpu.dot_dimension_numbers<[1], [0], [0], [1], [0, 0, 1, 1], [], []>} : vector<224x8xf32>, vector<8x16xf32>, vector<224x16xf32> -> vector<224x16xf32>
    %36 = arith.addf %30, %35 : vector<224x16xf32>
    %c0_39 = arith.constant 0 : index
    %c0_40 = arith.constant 0 : index
    %c32 = arith.constant 32 : index
    %c0_41 = arith.constant 0 : index
    %37 = vector.load %arg2[%c0_39, %c0_40, %c32, %c0_41] : memref<1x1x272x8xf32, #tpu.memory_space<vmem>>, vector<1x1x224x8xf32>
    %38 = vector.shape_cast %37 : vector<1x1x224x8xf32> to vector<224x8xf32>
    %c6 = arith.constant 6 : index
    %c0_42 = arith.constant 0 : index
    %c0_43 = arith.constant 0 : index
    %39 = vector.load %arg3[%c6, %c0_42, %c0_43] : memref<9x8x16xf32, #tpu.memory_space<vmem>>, vector<1x8x16xf32>
    %40 = vector.shape_cast %39 : vector<1x8x16xf32> to vector<8x16xf32>
    %cst_44 = arith.constant dense<0.000000e+00> : vector<224x16xf32>
    %41 = tpu.matmul %38, %40, %cst_44 {dimension_numbers = #tpu.dot_dimension_numbers<[1], [0], [0], [1], [0, 0, 1, 1], [], []>} : vector<224x8xf32>, vector<8x16xf32>, vector<224x16xf32> -> vector<224x16xf32>
    %42 = arith.addf %36, %41 : vector<224x16xf32>
    %c0_45 = arith.constant 0 : index
    %c0_46 = arith.constant 0 : index
    %c33 = arith.constant 33 : index
    %c0_47 = arith.constant 0 : index
    %43 = vector.load %arg2[%c0_45, %c0_46, %c33, %c0_47] : memref<1x1x272x8xf32, #tpu.memory_space<vmem>>, vector<1x1x224x8xf32>
    %44 = vector.shape_cast %43 : vector<1x1x224x8xf32> to vector<224x8xf32>
    %c7 = arith.constant 7 : index
    %c0_48 = arith.constant 0 : index
    %c0_49 = arith.constant 0 : index
    %45 = vector.load %arg3[%c7, %c0_48, %c0_49] : memref<9x8x16xf32, #tpu.memory_space<vmem>>, vector<1x8x16xf32>
    %46 = vector.shape_cast %45 : vector<1x8x16xf32> to vector<8x16xf32>
    %cst_50 = arith.constant dense<0.000000e+00> : vector<224x16xf32>
    %47 = tpu.matmul %44, %46, %cst_50 {dimension_numbers = #tpu.dot_dimension_numbers<[1], [0], [0], [1], [0, 0, 1, 1], [], []>} : vector<224x8xf32>, vector<8x16xf32>, vector<224x16xf32> -> vector<224x16xf32>
    %48 = arith.addf %42, %47 : vector<224x16xf32>
    %c0_51 = arith.constant 0 : index
    %c0_52 = arith.constant 0 : index
    %c34 = arith.constant 34 : index
    %c0_53 = arith.constant 0 : index
    %49 = vector.load %arg2[%c0_51, %c0_52, %c34, %c0_53] : memref<1x1x272x8xf32, #tpu.memory_space<vmem>>, vector<1x1x224x8xf32>
    %50 = vector.shape_cast %49 : vector<1x1x224x8xf32> to vector<224x8xf32>
    %c8 = arith.constant 8 : index
    %c0_54 = arith.constant 0 : index
    %c0_55 = arith.constant 0 : index
    %51 = vector.load %arg3[%c8, %c0_54, %c0_55] : memref<9x8x16xf32, #tpu.memory_space<vmem>>, vector<1x8x16xf32>
    %52 = vector.shape_cast %51 : vector<1x8x16xf32> to vector<8x16xf32>
    %cst_56 = arith.constant dense<0.000000e+00> : vector<224x16xf32>
    %53 = tpu.matmul %50, %52, %cst_56 {dimension_numbers = #tpu.dot_dimension_numbers<[1], [0], [0], [1], [0, 0, 1, 1], [], []>} : vector<224x8xf32>, vector<8x16xf32>, vector<224x16xf32> -> vector<224x16xf32>
    %54 = arith.addf %48, %53 : vector<224x16xf32>
    %c0_57 = arith.constant 0 : index
    %c0_58 = arith.constant 0 : index
    %55 = vector.load %arg4[%c0_57, %c0_58] : memref<1x16xf32, #tpu.memory_space<vmem>>, vector<1x16xf32>
    %56 = vector.broadcast %55 : vector<1x16xf32> to vector<224x16xf32>
    %57 = arith.addf %54, %56 : vector<224x16xf32>
    %c0_59 = arith.constant 0 : index
    %c0_60 = arith.constant 0 : index
    %c0_61 = arith.constant 0 : index
    %c0_62 = arith.constant 0 : index
    %58 = vector.load %arg5[%c0_59, %c0_60, %c0_61, %c0_62] : memref<1x1x224x16xf32, #tpu.memory_space<vmem>>, vector<1x1x224x16xf32>
    %59 = vector.shape_cast %58 : vector<1x1x224x16xf32> to vector<224x16xf32>
    %60 = vector.shape_cast %57 : vector<224x16xf32> to vector<1x1x224x16xf32>
    tpu.vector_store %arg5[%c0_59, %c0_60, %c0_61, %c0_62], %60 {strides = array<i32>} : memref<1x1x224x16xf32, #tpu.memory_space<vmem>>, vector<1x1x224x16xf32>,
    return
  }
  func.func @transform_0(%arg0: i32, %arg1: i32) -> (i32, i32, i32, i32) {
    %c0_i32 = arith.constant 0 : i32
    %c0_i32_0 = arith.constant 0 : i32
    %c0_i32_1 = arith.constant 0 : i32
    return %arg0, %arg1, %c0_i32, %c0_i32_0 : i32, i32, i32, i32
  }
  func.func @transform_1(%arg0: i32, %arg1: i32) -> (i32, i32, i32) {
    %c0_i32 = arith.constant 0 : i32
    %c0_i32_0 = arith.constant 0 : i32
    %c0_i32_1 = arith.constant 0 : i32
    %c0_i32_2 = arith.constant 0 : i32
    return %c0_i32, %c0_i32_0, %c0_i32_1 : i32, i32, i32
  }
  func.func @transform_2(%arg0: i32, %arg1: i32) -> (i32, i32) {
    %c0_i32 = arith.constant 0 : i32
    %c0_i32_0 = arith.constant 0 : i32
    %c0_i32_1 = arith.constant 0 : i32
    return %c0_i32, %c0_i32_0 : i32, i32
  }
  func.func @transform_3(%arg0: i32, %arg1: i32) -> (i32, i32, i32, i32) {
    %c0_i32 = arith.constant 0 : i32
    %c0_i32_0 = arith.constant 0 : i32
    %c0_i32_1 = arith.constant 0 : i32
    return %arg0, %arg1, %c0_i32, %c0_i32_0 : i32, i32, i32, i32
  }
}

</mosaic_0001>

<bundles_post_ra>
// kernel: custom-call.1
= control target key start
LH: loop header
LB: loop body
LE: loop exit
PB: predicated region body
PF: predicated region fallthrough
CT: control target
= control target key end

     0   :  { %s217_s0 = inlined_call_operand.vmem [shape: c64[2,4,16,16], index: 0, kind: input, shape index: {}]   ;;  %s218_s1 = inlined_call_operand.vmem [shape: f32[2,4,16,16], index: 1, kind: output, shape index: {}]  }
   0x1   :  { %v80_v0 = vld [vmem:[%s217_s0 + $0x80] sm:$0xff]  ;;  %v81_v1 = vld [vmem:[%s217_s0 + $0x88] sm:$0xff]  ;;  %v83_v2 = vld [vmem:[%s217_s0 + $0x90] sm:$0xff] }
   0x2   :  { %4 = vst [vmem:[%s218_s1] sm:$0xff] %v80_v0  ;;  %v85_v3 = vld [vmem:[%s217_s0 + $0x98] sm:$0xff]  ;;  %v87_v4 = vld [vmem:[%s217_s0 + $0xa0] sm:$0xff]  ;;  %v89_v5 = vld [vmem:[%s217_s0 + $0xa8] sm:$0xff] }
   0x3   :  { %82 = vst [vmem:[%s218_s1 + $0x8] sm:$0xff] %v81_v1  ;;  %v91_v6 = vld [vmem:[%s217_s0 + $0xb0] sm:$0xff]  ;;  %v93_v7 = vld [vmem:[%s217_s0 + $0xb8] sm:$0xff]  ;;  %v95_v8 = vld [vmem:[%s217_s0 + $0xc0] sm:$0xff] }
   0x4   :  { %84 = vst [vmem:[%s218_s1 + $0x10] sm:$0xff] %v83_v2  ;;  %v97_v9 = vld [vmem:[%s217_s0 + $0xc8] sm:$0xff]  ;;  %v99_v10 = vld [vmem:[%s217_s0 + $0xd0] sm:$0xff]  ;;  %v101_v11 = vld [vmem:[%s217_s0 + $0xd8] sm:$0xff] }
   0x5   :  { %86 = vst [vmem:[%s218_s1 + $0x18] sm:$0xff] %v85_v3  ;;  %v103_v12 = vld [vmem:[%s217_s0 + $0xe0] sm:$0xff]  ;;  %v105_v13 = vld [vmem:[%s217_s0 + $0xe8] sm:$0xff]  ;;  %v107_v14 = vld [vmem:[%s217_s0 + $0xf0] sm:$0xff] }
   0x6   :  { %88 = vst [vmem:[%s218_s1 + $0x20] sm:$0xff] %v87_v4  ;;  %v109_v15 = vld [vmem:[%s217_s0 + $0xf8] sm:$0xff] }
   0x7   :  { %90 = vst [vmem:[%s218_s1 + $0x28] sm:$0xff] %v89_v5 }
   0x8   :  { %92 = vst [vmem:[%s218_s1 + $0x30] sm:$0xff] %v91_v6 }
   0x9   :  { %94 = vst [vmem:[%s218_s1 + $0x38] sm:$0xff] %v93_v7 }
   0xa   :  { %96 = vst [vmem:[%s218_s1 + $0x40] sm:$0xff] %v95_v8 }
   0xb   :  { %98 = vst [vmem:[%s218_s1 + $0x48] sm:$0xff] %v97_v9 }
   0xc   :  { %100 = vst [vmem:[%s218_s1 + $0x50] sm:$0xff] %v99_v10 }
   0xd   :  { %102 = vst [vmem:[%s218_s1 + $0x58] sm:$0xff] %v101_v11 }
   0xe   :  { %104 = vst [vmem:[%s218_s1 + $0x60] sm:$0xff] %v103_v12 }
   0xf   :  { %106 = vst [vmem:[%s218_s1 + $0x68] sm:$0xff] %v105_v13 }
  0x10   :  { %108 = vst [vmem:[%s218_s1 + $0x70] sm:$0xff] %v107_v14 }
  0x11   :  { %110 = vst [vmem:[%s218_s1 + $0x78] sm:$0xff] %v109_v15 }

// kernel: neg.1
= control target key start
LH: loop header
LB: loop body
LE: loop exit
PB: predicated region body
PF: predicated region fallthrough
CT: control target
= control target key end

     0   :  { %2 = vsyncpa [#allocation1], 0  ;;  %s124_s8 = smov [#allocation0]   ;;  %s125_s10 = smov 64   ;;  %s167_s0 = inlined_call_operand.hbm [shape: f32[9,4,8], index: 0, kind: input, shape index: {}]   ;;  %s168_s1 = inlined_call_operand.vmem [shape: f32[9,4,8], index: 1, kind: output, shape index: {}]  }
   0x1   :  { %s5_s0 = sshll.u32 %s167_s0, 4  ;;  %s7_s9 = sshll.u32 %s124_s8, 4  ;;  %s6_s0 = int_to_ptr.hbm [resolvable:$true] %s5_s0  ;;  %s8_s9 = int_to_ptr.vmem [resolvable:$true] %s7_s9 }
   0x2   :  { %s126_s11 = smov 4  }
   0x3   :  { %13 = dma.hbm_to_vmem [thread:$0]  %s6_s0, 576, %s8_s9, [#allocation1], %s125_s10, %s125_s10, %s126_s11  }
   0x4   :  { %122 = dma.done.wait [#allocation1], 576  }
   0x5   :  { %123 = vsyncadd [#allocation1], 4294966720  ;;  %v16_v0 = vld [vmem:[#allocation0] sm:$0xf]  ;;  %v23_v1 = vld [vmem:[#allocation0 + $0x4] sm:$0xf] }
   0x6   :  { %v31_v2 = vld [vmem:[#allocation0 + $0x8] sm:$0xf]  ;;  %v19_v3 = vxor.u32 2147483648, %v16_v0  ;;  %v26_v4 = vxor.u32 2147483648, %v23_v1  ;;  %v39_v6 = vld [vmem:[#allocation0 + $0xc] sm:$0xf] }
   0x7   :  { %v34_v5 = vxor.u32 2147483648, %v31_v2  ;;  %v42_v7 = vxor.u32 2147483648, %v39_v6  ;;  %v47_v8 = vld [vmem:[#allocation0 + $0x10] sm:$0xf]  ;;  %v55_v9 = vld [vmem:[#allocation0 + $0x14] sm:$0xf] }
   0x8   :  { %21 = vst [vmem:[%s168_s1] sm:$0xf] %v19_v3  ;;  %v50_v10 = vxor.u32 2147483648, %v47_v8  ;;  %v63_v11 = vld [vmem:[#allocation0 + $0x18] sm:$0xf]  ;;  %v58_v12 = vxor.u32 2147483648, %v55_v9 }
   0x9   :  { %87 = vst [vmem:[%s168_s1 + $0x4] sm:$0xf] %v26_v4  ;;  %v71_v13 = vld [vmem:[#allocation0 + $0x1c] sm:$0xf]  ;;  %v66_v14 = vxor.u32 2147483648, %v63_v11 }
   0xa   :  { %88 = vst [vmem:[%s168_s1 + $0x8] sm:$0xf] %v34_v5  ;;  %v79_v15 = vld [vmem:[#allocation0 + $0x20] sm:$0xf]  ;;  %v74_v16 = vxor.u32 2147483648, %v71_v13 }
   0xb   :  { %89 = vst [vmem:[%s168_s1 + $0xc] sm:$0xf] %v42_v7  ;;  %v82_v17 = vxor.u32 2147483648, %v79_v15 }
   0xc   :  { %90 = vst [vmem:[%s168_s1 + $0x10] sm:$0xf] %v50_v10 }
   0xd   :  { %91 = vst [vmem:[%s168_s1 + $0x14] sm:$0xf] %v58_v12 }
   0xe   :  { %92 = vst [vmem:[%s168_s1 + $0x18] sm:$0xf] %v66_v14 }
   0xf   :  { %93 = vst [vmem:[%s168_s1 + $0x1c] sm:$0xf] %v74_v16 }
  0x10   :  { %94 = vst [vmem:[%s168_s1 + $0x20] sm:$0xf] %v82_v17 }
  0x11   :  { %86 = vsyncpa [#allocation1], 1 }

// kernel: custom-call
= control target key start
LH: loop header
LB: loop body
LE: loop exit
PB: predicated region body
PF: predicated region fallthrough
CT: control target
= control target key end

     0   :  { %s200_s0 = inlined_call_operand.vmem [shape: c64[2,4,16,16], index: 0, kind: input, shape index: {}]   ;;  %s201_s1 = inlined_call_operand.vmem [shape: f32[2,4,16,16], index: 1, kind: output, shape index: {}]  }
   0x1   :  { %v2_v0 = vld [vmem:[%s200_s0] sm:$0xff]  ;;  %v64_v1 = vld [vmem:[%s200_s0 + $0x8] sm:$0xff]  ;;  %v66_v2 = vld [vmem:[%s200_s0 + $0x10] sm:$0xff] }
   0x2   :  { %3 = vst [vmem:[%s201_s1] sm:$0xff] %v2_v0  ;;  %v68_v3 = vld [vmem:[%s200_s0 + $0x18] sm:$0xff]  ;;  %v70_v4 = vld [vmem:[%s200_s0 + $0x20] sm:$0xff]  ;;  %v72_v5 = vld [vmem:[%s200_s0 + $0x28] sm:$0xff] }
   0x3   :  { %65 = vst [vmem:[%s201_s1 + $0x8] sm:$0xff] %v64_v1  ;;  %v74_v6 = vld [vmem:[%s200_s0 + $0x30] sm:$0xff]  ;;  %v76_v7 = vld [vmem:[%s200_s0 + $0x38] sm:$0xff]  ;;  %v78_v8 = vld [vmem:[%s200_s0 + $0x40] sm:$0xff] }
   0x4   :  { %67 = vst [vmem:[%s201_s1 + $0x10] sm:$0xff] %v66_v2  ;;  %v80_v9 = vld [vmem:[%s200_s0 + $0x48] sm:$0xff]  ;;  %v82_v10 = vld [vmem:[%s200_s0 + $0x50] sm:$0xff]  ;;  %v84_v11 = vld [vmem:[%s200_s0 + $0x58] sm:$0xff] }
   0x5   :  { %69 = vst [vmem:[%s201_s1 + $0x18] sm:$0xff] %v68_v3  ;;  %v86_v12 = vld [vmem:[%s200_s0 + $0x60] sm:$0xff]  ;;  %v88_v13 = vld [vmem:[%s200_s0 + $0x68] sm:$0xff]  ;;  %v90_v14 = vld [vmem:[%s200_s0 + $0x70] sm:$0xff] }
   0x6   :  { %71 = vst [vmem:[%s201_s1 + $0x20] sm:$0xff] %v70_v4  ;;  %v92_v15 = vld [vmem:[%s200_s0 + $0x78] sm:$0xff] }
   0x7   :  { %73 = vst [vmem:[%s201_s1 + $0x28] sm:$0xff] %v72_v5 }
   0x8   :  { %75 = vst [vmem:[%s201_s1 + $0x30] sm:$0xff] %v74_v6 }
   0x9   :  { %77 = vst [vmem:[%s201_s1 + $0x38] sm:$0xff] %v76_v7 }
   0xa   :  { %79 = vst [vmem:[%s201_s1 + $0x40] sm:$0xff] %v78_v8 }
   0xb   :  { %81 = vst [vmem:[%s201_s1 + $0x48] sm:$0xff] %v80_v9 }
   0xc   :  { %83 = vst [vmem:[%s201_s1 + $0x50] sm:$0xff] %v82_v10 }
   0xd   :  { %85 = vst [vmem:[%s201_s1 + $0x58] sm:$0xff] %v84_v11 }
   0xe   :  { %87 = vst [vmem:[%s201_s1 + $0x60] sm:$0xff] %v86_v12 }
   0xf   :  { %89 = vst [vmem:[%s201_s1 + $0x68] sm:$0xff] %v88_v13 }
  0x10   :  { %91 = vst [vmem:[%s201_s1 + $0x70] sm:$0xff] %v90_v14 }
  0x11   :  { %93 = vst [vmem:[%s201_s1 + $0x78] sm:$0xff] %v92_v15 }

// kernel: custom-call.2
= control target key start
LH: loop header
LB: loop body
LE: loop exit
PB: predicated region body
PF: predicated region fallthrough
CT: control target
= control target key end

     0   :  { %s105_s0 = inlined_call_operand.vmem [shape: f32[2,8,14,14], index: 0, kind: input, shape index: {}]   ;;  %s106_s1 = inlined_call_operand.vmem [shape: f32[2,8,14,14], index: 1, kind: input, shape index: {}]   ;;  %s107_s2 = inlined_call_operand.hbm [shape: c64[2,8,14,14], index: 2, kind: output, shape index: {}]  }
   0x1   :  { %s3_s11 = scalar_lea.hbm %s107_s2, 224 }
   0x2   :  { %4 = vsyncpa [#allocation0], 0  ;;  %s6_s14 = sshll.u32 %s105_s0, 4  ;;  %s8_s17 = sshll.u32 %s107_s2, 4  ;;  %s7_s14 = int_to_ptr.vmem [resolvable:$true] %s6_s14  ;;  %s9_s17 = int_to_ptr.hbm [resolvable:$true] %s8_s17 }
   0x3   :  { %11 = dma.vmem_to_hbm [thread:$0]  %s7_s14, 3584, %s9_s17, [#allocation0] }
   0x4   :  { %74 = dma.done.wait [#allocation0], 3584  }
   0x5   :  { %75 = vsyncadd [#allocation0], 4294963712 }
   0x6   :  { %14 = vsyncpa [#allocation0], 1 }
   0x7   :  { %15 = vsyncpa [#allocation1], 0  ;;  %s17_s20 = sshll.u32 %s106_s1, 4  ;;  %s19_s21 = sshll.u32 %s3_s11, 4  ;;  %s18_s20 = int_to_ptr.vmem [resolvable:$true] %s17_s20  ;;  %s20_s21 = int_to_ptr.hbm [resolvable:$true] %s19_s21 }
   0x8   :  { %22 = dma.vmem_to_hbm [thread:$0]  %s18_s20, 3584, %s20_s21, [#allocation1] }
   0x9   :  { %76 = dma.done.wait [#allocation1], 3584  }
   0xa   :  { %77 = vsyncadd [#allocation1], 4294963712 }
   0xb   :  { %25 = vsyncpa [#allocation1], 1 }

// kernel: complex_conv2d.1
= control target key start
LH: loop header
LB: loop body
LE: loop exit
PB: predicated region body
PF: predicated region fallthrough
CT: control target
= control target key end

     0   :  { %s2834_s12 = smov 0   ;;  %s2836_s13 = smov 0   ;;  %s3891_s0 = inlined_call_operand.vmem [shape: f32[2,1,272,8], index: 0, kind: input, shape index: {}]   ;;  %s3892_s1 = inlined_call_operand.vmem [shape: f32[9,8,16], index: 1, kind: input, shape index: {}]   ;;  %s3893_s2 = inlined_call_operand.vmem [shape: f32[1,16], index: 2, kind: input, shape index: {}]   ;;  %s3894_s3 = inlined_call_operand.vmem [shape: f32[2,1,224,16], index: 3, kind: output, shape index: {}]  }
   0x1   :  { %s2838_s14 = smov 0  }
   0x2 LB: > { %s25_s15 = sadd.s32 1, %s2808_s13  ;;  %p2495_p0 = scmp.ge.s32.totalorder %s2812_s14, 1  ;;  %s2812_s14 = sphi %s2838_s14, %s13_s14   ;;  %s2808_s13 = sphi %s2836_s13, %s3996_s13   ;;  %s2804_s12 = sphi %s2834_s12, %s3995_s12  }
   0x3   : > { %p27_p1 = scmp.ge.s32.totalorder %s25_s15, 2  ;;  %p157_p2 = scmp.lt.s32.totalorder %s2812_s14, 3 }
   0x5   : > { %s3998_s15 = smov (%p27_p1, %s25_s15), 0  ;;  %p158_p3 = pnand %p2495_p0, %p157_p2 }
   0x7   : > { %161 = sbr.rel (%p158_p3) target bundleno = 656 (0x290), region = 32 }
   0xc   : > { %v2498_v0 = vld [vmem:[%s3892_s1 + $0x8] sm:$0xff]  ;;  %p189_p4 = scmp.lt.s32.totalorder %s2804_s12, 1  ;;  %v2555_v1 = vld [vmem:[%s3892_s1 + $0x10] sm:$0xff]  ;;  %v2584_v2 = vld [vmem:[%s3892_s1 + $0x18] sm:$0xff]  ;;  %vm266_vm0 = vcmask 64512   ;;  %vm2370_vm1 = vcmask 130048  }
   0xd   : > { %2760 = vmatpush.msra.mxu1 %v2498_v0  ;;  %2761 = vmatpush.msra.mxu2 %v2498_v0  ;;  %v235_v3 = vld [vmem:[%s3892_s1] sm:$0xff]  ;;  %v2671_v21 = vld [vmem:[%s3892_s1 + $0x30] sm:$0xff]  ;;  %v2700_v22 = vld [vmem:[%s3892_s1 + $0x38] sm:$0xff] }
   0xe   : > { %s4000_s12 = smov (!%p189_p4, %s2804_s12), 1  ;;  %2762 = vmatpush.msra.mxu3 %v2498_v0  ;;  %v2613_v4 = vld [vmem:[%s3892_s1 + $0x20] sm:$0xff]  ;;  %366 = vmatpush.msra.mxu0 %v2498_v0  ;;  %v2642_v23 = vld [vmem:[%s3892_s1 + $0x28] sm:$0xff] }
   0xf   : > { %766 = vmatpush.msrb.mxu2 %v2555_v1  ;;  %551 = vmatpush.msrb.mxu1 %v235_v3  ;;  %s2763_s26 = smul.u32 272, %s4000_s12  ;;  %v2729_v28 = vld [vmem:[%s3892_s1 + $0x40] sm:$0xff] }
  0x10   : > { %1009 = vmatpush.msrb.mxu3 %v2584_v2  ;;  %1252 = vmatpush.msrb.mxu0 %v2613_v4  ;;  %s2764_s11 = smul.u32 224, %s4000_s12 }
  0x11   : > { %s2873_s29 = scalar_lea.vmem %s3891_s0, %s2763_s26 }
  0x12   : > { %v2876_v5 = vld [vmem:[%s2873_s29 + $0x39] sm:$0xff]  ;;  %v2879_v6 = vld [vmem:[%s2873_s29 + $0x71] sm:$0xff]  ;;  %v2882_v7 = vld [vmem:[%s2873_s29 + $0xa9] sm:$0xff]  ;;  %s3688_s12 = scalar_lea.vmem %s3894_s3, %s2764_s11 }
  0x13   : > { %2506 = vmatmul.msk.f32.vlgmr.msra.gmra.mxu1 %vm266_vm0, %v2876_v5  ;;  %2513 = vmatmul.msk.f32.vlgmr.msra.gmra.mxu2 %vm266_vm0, %v2879_v6  ;;  %v236_v8 = vld [vmem:[%s2873_s29 + $0x1] sm:$0xff]  ;;  %v2896_v10 = vld [vmem:[%s2873_s29 + $0x79] sm:$0xff]  ;;  %v2899_v11 = vld [vmem:[%s2873_s29 + $0xb1] sm:$0xff] }
  0x14   : > { %2520 = vmatmul.msk.f32.vlgmr.msra.gmra.mxu3 %vm266_vm0, %v2882_v7  ;;  %2499 = vmatmul.msk.f32.vlgmr.msra.gmra.mxu0 %vm266_vm0, %v236_v8  ;;  %v2893_v9 = vld [vmem:[%s2873_s29 + $0x41] sm:$0xff]  ;;  %v237_v12 = vld [vmem:[%s2873_s29 + $0x9] sm:$0xff]  ;;  %v2916_v15 = vld [vmem:[%s2873_s29 + $0xb9] sm:$0xff] }
  0x15   : > { %v2910_v13 = vld [vmem:[%s2873_s29 + $0x49] sm:$0xff]  ;;  %v2913_v14 = vld [vmem:[%s2873_s29 + $0x81] sm:$0xff]  ;;  %v238_v16 = vld [vmem:[%s2873_s29 + $0x11] sm:$0xff]  ;;  %1738 = vmatpush.msra.mxu2 %v2671_v21  ;;  %1981 = vmatpush.msra.mxu3 %v2700_v22 }
  0x16   : > { %v2927_v17 = vld [vmem:[%s2873_s29 + $0x51] sm:$0xff]  ;;  %v2930_v18 = vld [vmem:[%s2873_s29 + $0x89] sm:$0xff]  ;;  %v2933_v19 = vld [vmem:[%s2873_s29 + $0xc1] sm:$0xff]  ;;  %1495 = vmatpush.msra.mxu1 %v2642_v23  ;;  %2224 = vmatpush.msra.mxu0 %v2729_v28 }
  0x17   : > { %v239_v20 = vld [vmem:[%s2873_s29 + $0x19] sm:$0xff]  ;;  %v2956_v25 = vld [vmem:[%s2873_s29 + $0x91] sm:$0xff]  ;;  %v2959_v26 = vld [vmem:[%s2873_s29 + $0xc9] sm:$0xff] }
  0x18   : > { %v2953_v24 = vld [vmem:[%s2873_s29 + $0x59] sm:$0xff]  ;;  %v2962_v27 = vld [vmem:[%s2873_s29 + $0x21] sm:$0xff]  ;;  %v2982_v31 = vld [vmem:[%s2873_s29 + $0xd1] sm:$0xff] }
  0x19   : > { %3921 = vst [vmem:[#allocation2_spill] sm:$0xff] %v2953_v24  ;;  %v2976_v29 = vld [vmem:[%s2873_s29 + $0x61] sm:$0xff]  ;;  %v2979_v30 = vld [vmem:[%s2873_s29 + $0x99] sm:$0xff]  ;;  %v2985_v32 = vld [vmem:[%s2873_s29 + $0x29] sm:$0xff] }
  0x1a   : > { %3922 = vst [vmem:[#allocation3_spill] sm:$0xff] %v2976_v29  ;;  %v2996_v33 = vld [vmem:[%s2873_s29 + $0x69] sm:$0xff]  ;;  %v2999_v34 = vld [vmem:[%s2873_s29 + $0xa1] sm:$0xff]  ;;  %v3002_v35 = vld [vmem:[%s2873_s29 + $0xd9] sm:$0xff] }
  0x1b   : > { %2507 = vmatmul.msk.f32.gmra.mxu1 %vm266_vm0, %v2893_v9  ;;  %2514 = vmatmul.msk.f32.gmra.mxu2 %vm266_vm0, %v2896_v10  ;;  %v3005_v36 = vld [vmem:[%s2873_s29 + $0x31] sm:$0xff]  ;;  %v207_v37 = vld [vmem:[%s2873_s29] sm:$0xff]  ;;  %v208_v40 = vld [vmem:[%s2873_s29 + $0x8] sm:$0xff] }
  0x1c   : > { %2521 = vmatmul.msk.f32.gmra.mxu3 %vm266_vm0, %v2899_v11  ;;  %2500 = vmatmul.msk.f32.gmra.mxu0 %vm266_vm0, %v237_v12  ;;  %v637_v38 = vld [vmem:[%s2873_s29 + $0x2] sm:$0xff]  ;;  %v880_v39 = vld [vmem:[%s2873_s29 + $0x10] sm:$0xff]  ;;  %v881_v42 = vld [vmem:[%s2873_s29 + $0x18] sm:$0xff] }
  0x1d   : > { %v638_v41 = vld [vmem:[%s2873_s29 + $0xa] sm:$0xff]  ;;  %v3030_v43 = vld [vmem:[%s2873_s29 + $0x12] sm:$0xff]  ;;  %v3033_v44 = vld [vmem:[%s2873_s29 + $0x20] sm:$0xff] }
  0x1e   : > { %v3043_v45 = vld [vmem:[%s2873_s29 + $0x1a] sm:$0xff]  ;;  %v3046_v46 = vld [vmem:[%s2873_s29 + $0x28] sm:$0xff]  ;;  %v3059_v48 = vld [vmem:[%s2873_s29 + $0x30] sm:$0xff] }
  0x1f   : > { %v3056_v47 = vld [vmem:[%s2873_s29 + $0x22] sm:$0xff]  ;;  %v3070_v49 = vld [vmem:[%s2873_s29 + $0x2a] sm:$0xff]  ;;  %v3073_v50 = vld [vmem:[%s2873_s29 + $0x38] sm:$0xff] }
  0x20   : > { %v3084_v51 = vld [vmem:[%s2873_s29 + $0x32] sm:$0xff]  ;;  %v3087_v52 = vld [vmem:[%s2873_s29 + $0x40] sm:$0xff]  ;;  %v3101_v54 = vld [vmem:[%s2873_s29 + $0x48] sm:$0xff] }
  0x21   : > { %v3098_v53 = vld [vmem:[%s2873_s29 + $0x3a] sm:$0xff]  ;;  %v3112_v55 = vld [vmem:[%s2873_s29 + $0x42] sm:$0xff]  ;;  %v3115_v56 = vld [vmem:[%s2873_s29 + $0x50] sm:$0xff] }
  0x22   : > { %v3128_v58 = vld [vmem:[%s2873_s29 + $0x4a] sm:$0xff]  ;;  %v3131_v59 = vld [vmem:[%s2873_s29 + $0x58] sm:$0xff]  ;;  %v3153_v1 = vld [vmem:[%s2873_s29 + $0x60] sm:$0xff] }
  0x23   : > { %2508 = vmatmul.msk.f32.gmra.mxu1 %vm266_vm0, %v2910_v13  ;;  %2515 = vmatmul.msk.f32.gmra.mxu2 %vm266_vm0, %v2913_v14  ;;  %3923 = vst [vmem:[#allocation4_spill] sm:$0xff] %v3131_v59  ;;  %v3150_v0 = vld [vmem:[%s2873_s29 + $0x52] sm:$0xff]  ;;  %v3172_v12 = vld [vmem:[%s2873_s29 + $0x5a] sm:$0xff]  ;;  %v3194_v28 = vld [vmem:[%s2873_s29 + $0x62] sm:$0xff] }
  0x24   : > { %2522 = vmatmul.msk.f32.gmra.mxu3 %vm266_vm0, %v2916_v15  ;;  %2501 = vmatmul.msk.f32.gmra.mxu0 %vm266_vm0, %v238_v16  ;;  %3925 = vst [vmem:[#allocation6_spill] sm:$0xff] %v3150_v0 }
  0x25   : > { %3926 = vst [vmem:[#allocation7_spill] sm:$0xff] %v3153_v1 }
  0x26   : > { %3928 = vst [vmem:[#allocation9_spill] sm:$0xff] %v3172_v12 }
  0x27   : > { %3931 = vst [vmem:[#allocation12_spill] sm:$0xff] %v3194_v28 }
  0x2b   : > { %2509 = vmatmul.msk.f32.gmra.mxu1 %vm266_vm0, %v2927_v17  ;;  %2516 = vmatmul.msk.f32.gmra.mxu2 %vm266_vm0, %v2930_v18 }
  0x2c   : > { %2523 = vmatmul.msk.f32.gmra.mxu3 %vm266_vm0, %v2933_v19  ;;  %2502 = vmatmul.msk.f32.gmra.mxu0 %vm266_vm0, %v239_v20 }
  0x33   : > { %2510 = vmatmul.msk.f32.gmra.mxu1 %vm266_vm0, %v2953_v24  ;;  %2517 = vmatmul.msk.f32.gmra.mxu2 %vm266_vm0, %v2956_v25 }
  0x34   : > { %2524 = vmatmul.msk.f32.gmra.mxu3 %vm266_vm0, %v2959_v26  ;;  %2503 = vmatmul.msk.f32.gmra.mxu0 %vm266_vm0, %v2962_v27 }
  0x3b   : > { %2511 = vmatmul.msk.f32.gmra.mxu1 %vm266_vm0, %v2976_v29  ;;  %2518 = vmatmul.msk.f32.gmra.mxu2 %vm266_vm0, %v2979_v30 }
  0x3c   : > { %2525 = vmatmul.msk.f32.gmra.mxu3 %vm266_vm0, %v2982_v31  ;;  %2504 = vmatmul.msk.f32.gmra.mxu0 %vm266_vm0, %v2985_v32 }
  0x43   : > { %2512 = vmatmul.msk.f32.gmra.mxu1 %vm266_vm0, %v2996_v33  ;;  %2519 = vmatmul.msk.f32.gmra.mxu2 %vm266_vm0, %v2999_v34 }
  0x44   : > { %2526 = vmatmul.msk.f32.gmra.mxu3 %vm266_vm0, %v3002_v35  ;;  %2505 = vmatmul.msk.f32.gmra.mxu0 %vm266_vm0, %v3005_v36 }
  0x4b   : > { %2527 = vmatmul.msk.f32.vlgmr.msrb.gmra.mxu1 %vm266_vm0, %v207_v37  ;;  %2556 = vmatmul.msk.f32.vlgmr.msrb.gmra.mxu2 %vm266_vm0, %v637_v38  ;;  %v3197_v37 = vld [vmem:[%s2873_s29 + $0x70] sm:$0xff] }
  0x4c   : > { %2585 = vmatmul.msk.f32.vlgmr.msrb.gmra.mxu3 %vm266_vm0, %v880_v39  ;;  %2614 = vmatmul.msk.f32.vlgmr.msrb.gmra.mxu0 %vm266_vm0, %v238_v16  ;;  %v3175_v16 = vld [vmem:[%s2873_s29 + $0x68] sm:$0xff]  ;;  %3932 = vst [vmem:[#allocation13_spill] sm:$0xff] %v3197_v37 }
  0x4d   : > { %3929 = vst [vmem:[#allocation10_spill] sm:$0xff] %v3175_v16 }
  0x53   : > { %2528 = vmatmul.msk.f32.gmra.mxu1 %vm266_vm0, %v208_v40  ;;  %2557 = vmatmul.msk.f32.gmra.mxu2 %vm266_vm0, %v638_v41  ;;  %v3216_v41 = vld [vmem:[%s2873_s29 + $0x6a] sm:$0xff] }
  0x54   : > { %2586 = vmatmul.msk.f32.gmra.mxu3 %vm266_vm0, %v881_v42  ;;  %2615 = vmatmul.msk.f32.gmra.mxu0 %vm266_vm0, %v239_v20  ;;  %3934 = vst [vmem:[#allocation15_spill] sm:$0xff] %v3216_v41 }
  0x5b   : > { %2529 = vmatmul.msk.f32.gmra.mxu1 %vm266_vm0, %v880_v39  ;;  %2558 = vmatmul.msk.f32.gmra.mxu2 %vm266_vm0, %v3030_v43 }
  0x5c   : > { %2587 = vmatmul.msk.f32.gmra.mxu3 %vm266_vm0, %v3033_v44  ;;  %2616 = vmatmul.msk.f32.gmra.mxu0 %vm266_vm0, %v2962_v27 }
  0x63   : > { %2530 = vmatmul.msk.f32.gmra.mxu1 %vm266_vm0, %v881_v42  ;;  %2559 = vmatmul.msk.f32.gmra.mxu2 %vm266_vm0, %v3043_v45  ;;  %v3219_v42 = vld [vmem:[%s2873_s29 + $0x78] sm:$0xff] }
  0x64   : > { %2588 = vmatmul.msk.f32.gmra.mxu3 %vm266_vm0, %v3046_v46  ;;  %2617 = vmatmul.msk.f32.gmra.mxu0 %vm266_vm0, %v2985_v32  ;;  %3935 = vst [vmem:[#allocation16_spill] sm:$0xff] %v3219_v42 }
  0x6b   : > { %2531 = vmatmul.msk.f32.gmra.mxu1 %vm266_vm0, %v3033_v44  ;;  %2560 = vmatmul.msk.f32.gmra.mxu2 %vm266_vm0, %v3056_v47 }
  0x6c   : > { %2589 = vmatmul.msk.f32.gmra.mxu3 %vm266_vm0, %v3059_v48  ;;  %2618 = vmatmul.msk.f32.gmra.mxu0 %vm266_vm0, %v3005_v36 }
  0x73   : > { %2532 = vmatmul.msk.f32.gmra.mxu1 %vm266_vm0, %v3046_v46  ;;  %2561 = vmatmul.msk.f32.gmra.mxu2 %vm266_vm0, %v3070_v49 }
  0x74   : > { %2590 = vmatmul.msk.f32.gmra.mxu3 %vm266_vm0, %v3073_v50  ;;  %2619 = vmatmul.msk.f32.gmra.mxu0 %vm266_vm0, %v2876_v5 }
  0x7b   : > { %2533 = vmatmul.msk.f32.gmra.mxu1 %vm266_vm0, %v3059_v48  ;;  %2562 = vmatmul.msk.f32.gmra.mxu2 %vm266_vm0, %v3084_v51 }
  0x7c   : > { %2591 = vmatmul.msk.f32.gmra.mxu3 %vm266_vm0, %v3087_v52  ;;  %2620 = vmatmul.msk.f32.gmra.mxu0 %vm266_vm0, %v2893_v9 }
  0x83   : > { %2534 = vmatmul.msk.f32.gmra.mxu1 %vm266_vm0, %v3073_v50  ;;  %2563 = vmatmul.msk.f32.gmra.mxu2 %vm266_vm0, %v3098_v53 }
  0x84   : > { %2592 = vmatmul.msk.f32.gmra.mxu3 %vm266_vm0, %v3101_v54  ;;  %2621 = vmatmul.msk.f32.gmra.mxu0 %vm266_vm0, %v2910_v13 }
  0x8b   : > { %2535 = vmatmul.msk.f32.gmra.mxu1 %vm266_vm0, %v3087_v52  ;;  %2564 = vmatmul.msk.f32.gmra.mxu2 %vm266_vm0, %v3112_v55 }
  0x8c   : > { %2593 = vmatmul.msk.f32.gmra.mxu3 %vm266_vm0, %v3115_v56  ;;  %2622 = vmatmul.msk.f32.gmra.mxu0 %vm266_vm0, %v2927_v17 }
  0x90   : > { %v3125_v57 = vpop.f32.mrf.mxu1 }
  0x91   : > { %v3133_v60 = vpop.f32.mrf.mxu0 }
  0x93   : > { %2536 = vmatmul.msk.f32.gmra.mxu1 %vm266_vm0, %v3101_v54  ;;  %2565 = vmatmul.msk.f32.gmra.mxu2 %vm266_vm0, %v3128_v58 }
  0x94   : > { %2594 = vmatmul.msk.f32.gmra.mxu3 %vm266_vm0, %v3131_v59  ;;  %2623 = vmatmul.msk.f32.gmra.mxu0 %vm266_vm0, %v2953_v24 }
  0x96   : > { %v3143_v61 = vpop.f32.mrf.mxu2 }
  0x97   : > { %v3145_v62 = vpop.f32.mrf.mxu3 }
  0x98   : > { %3924 = vst [vmem:[#allocation5_spill] sm:$0xff] %v3145_v62  ;;  %v3147_v63 = vpop.f32.mrf.mxu1  ;;  %v3238_v62 = vld [vmem:[%s2873_s29 + $0x72] sm:$0xff] }
  0x99   : > { %v3155_v2 = vpop.f32.mrf.mxu0  ;;  %3938 = vst [vmem:[#allocation19_spill] sm:$0xff] %v3238_v62 }
  0x9b   : > { %2537 = vmatmul.msk.f32.gmra.mxu1 %vm266_vm0, %v3115_v56  ;;  %2566 = vmatmul.msk.f32.gmra.mxu2 %vm266_vm0, %v3150_v0 }
  0x9c   : > { %2595 = vmatmul.msk.f32.gmra.mxu3 %vm266_vm0, %v3153_v1  ;;  %2624 = vmatmul.msk.f32.gmra.mxu0 %vm266_vm0, %v2976_v29  ;;  %v3260_v29 = vld [vmem:[%s2873_s29 + $0x7a] sm:$0xff] }
  0x9d   : > { %3942 = vst [vmem:[#allocation23_spill] sm:$0xff] %v3260_v29 }
  0x9e   : > { %v3165_v3 = vpop.f32.mrf.mxu2 }
  0x9f   : > { %v3167_v4 = vpop.f32.mrf.mxu3 }
  0xa0   : > { %3927 = vst [vmem:[#allocation8_spill] sm:$0xff] %v3167_v4  ;;  %v3169_v8 = vpop.f32.mrf.mxu1 }
  0xa1   : > { %v3177_v20 = vpop.f32.mrf.mxu0 }
  0xa3   : > { %2538 = vmatmul.msk.f32.gmra.mxu1 %vm266_vm0, %v3131_v59  ;;  %2567 = vmatmul.msk.f32.gmra.mxu2 %vm266_vm0, %v3172_v12  ;;  %v3283_v12 = vld [vmem:[%s2873_s29 + $0x90] sm:$0xff] }
  0xa4   : > { %2596 = vmatmul.msk.f32.gmra.mxu3 %vm266_vm0, %v3175_v16  ;;  %2625 = vmatmul.msk.f32.gmra.mxu0 %vm266_vm0, %v2996_v33  ;;  %v3295_v59 = vld [vmem:[%s2873_s29 + $0x8a] sm:$0xff] }
  0xa6   : > { %v3187_v21 = vpop.f32.mrf.mxu2 }
  0xa7   : > { %v3189_v22 = vpop.f32.mrf.mxu3 }
  0xa8   : > { %3930 = vst [vmem:[#allocation11_spill] sm:$0xff] %v3189_v22  ;;  %v3191_v23 = vpop.f32.mrf.mxu1 }
  0xa9   : > { %v3199_v38 = vpop.f32.mrf.mxu0 }
  0xab   : > { %2539 = vmatmul.msk.f32.gmra.mxu1 %vm266_vm0, %v3153_v1  ;;  %2568 = vmatmul.msk.f32.gmra.mxu2 %vm266_vm0, %v3194_v28 }
  0xac   : > { %2597 = vmatmul.msk.f32.gmra.mxu3 %vm266_vm0, %v3197_v37  ;;  %2626 = vmatmul.msk.f32.gmra.mxu0 %vm266_vm0, %v2879_v6 }
  0xae   : > { %v3209_v33 = vpop.f32.mrf.mxu2 }
  0xaf   : > { %v3211_v39 = vpop.f32.mrf.mxu3 }
  0xb0   : > { %3933 = vst [vmem:[#allocation14_spill] sm:$0xff] %v3211_v39  ;;  %v3213_v40 = vpop.f32.mrf.mxu1 }
  0xb1   : > { %v3221_v22 = vpop.f32.mrf.mxu0 }
  0xb3   : > { %2540 = vmatmul.msk.f32.gmra.mxu1 %vm266_vm0, %v3175_v16  ;;  %2569 = vmatmul.msk.f32.gmra.mxu2 %vm266_vm0, %v3216_v41  ;;  %v3241_v16 = vld [vmem:[%s2873_s29 + $0x80] sm:$0xff] }
  0xb4   : > { %2598 = vmatmul.msk.f32.gmra.mxu3 %vm266_vm0, %v3219_v42  ;;  %2627 = vmatmul.msk.f32.gmra.mxu0 %vm266_vm0, %v2896_v10  ;;  %3939 = vst [vmem:[#allocation20_spill] sm:$0xff] %v3241_v16 }
  0xb6   : > { %v3231_v6 = vpop.f32.mrf.mxu2 }
  0xb7   : > { %3936 = vst [vmem:[#allocation17_spill] sm:$0xff] %v3231_v6  ;;  %v3233_v39 = vpop.f32.mrf.mxu3  ;;  %v3298_v6 = vld [vmem:[%s2873_s29 + $0x98] sm:$0xff] }
  0xb8   : > { %3937 = vst [vmem:[#allocation18_spill] sm:$0xff] %v3233_v39  ;;  %v3235_v4 = vpop.f32.mrf.mxu1 }
  0xb9   : > { %v3243_v28 = vpop.f32.mrf.mxu0 }
  0xbb   : > { %2541 = vmatmul.msk.f32.gmra.mxu1 %vm266_vm0, %v3197_v37  ;;  %2570 = vmatmul.msk.f32.gmra.mxu2 %vm266_vm0, %v3238_v62  ;;  %v3263_v37 = vld [vmem:[%s2873_s29 + $0x88] sm:$0xff] }
  0xbc   : > { %2599 = vmatmul.msk.f32.gmra.mxu3 %vm266_vm0, %v3241_v16  ;;  %2628 = vmatmul.msk.f32.gmra.mxu0 %vm266_vm0, %v2913_v14 }
  0xbe   : > { %v3253_v10 = vpop.f32.mrf.mxu2 }
  0xbf   : > { %3940 = vst [vmem:[#allocation21_spill] sm:$0xff] %v3253_v10  ;;  %v3255_v39 = vpop.f32.mrf.mxu3  ;;  %v3280_v10 = vld [vmem:[%s2873_s29 + $0x82] sm:$0xff] }
  0xc0   : > { %3941 = vst [vmem:[#allocation22_spill] sm:$0xff] %v3255_v39  ;;  %v3257_v41 = vpop.f32.mrf.mxu1 }
  0xc1   : > { %v3265_v1 = vpop.f32.mrf.mxu0  ;;  %3945 = vst [vmem:[#allocation26_spill] sm:$0xff] %v3280_v10 }
  0xc3   : > { %2542 = vmatmul.msk.f32.gmra.mxu1 %vm266_vm0, %v3219_v42  ;;  %2571 = vmatmul.msk.f32.gmra.mxu2 %vm266_vm0, %v3260_v29 }
  0xc4   : > { %2600 = vmatmul.msk.f32.gmra.mxu3 %vm266_vm0, %v3263_v37  ;;  %2629 = vmatmul.msk.f32.gmra.mxu0 %vm266_vm0, %v2930_v18 }
  0xc6   : > { %v3275_v14 = vpop.f32.mrf.mxu2 }
  0xc7   : > { %3943 = vst [vmem:[#allocation24_spill] sm:$0xff] %v3275_v14  ;;  %v3277_v39 = vpop.f32.mrf.mxu3 }
  0xc8   : > { %3944 = vst [vmem:[#allocation25_spill] sm:$0xff] %v3277_v39  ;;  %v553_v62 = vpop.f32.mrf.mxu1 }
  0xc9   : > { %v1254_v42 = vpop.f32.mrf.mxu0  ;;  %v554_v18 = vadd.f32 %v553_v62, %v3133_v60 }
  0xcb   : > { %2543 = vmatmul.msk.f32.gmra.mxu1 %vm266_vm0, %v3241_v16  ;;  %2572 = vmatmul.msk.f32.gmra.mxu2 %vm266_vm0, %v3280_v10 }
  0xcc   : > { %2601 = vmatmul.msk.f32.gmra.mxu3 %vm266_vm0, %v3283_v12  ;;  %2630 = vmatmul.msk.f32.gmra.mxu0 %vm266_vm0, %v2956_v25 }
  0xce   : > { %v768_v39 = vpop.f32.mrf.mxu2 }
  0xcf   : > { %v852_v29 = vadd.f32 %v768_v39, %v554_v18  ;;  %v1011_v14 = vpop.f32.mrf.mxu3  ;;  %v3312_v39 = vld [vmem:[%s2873_s29 + $0x92] sm:$0xff] }
  0xd0   : > { %v556_v24 = vpop.f32.mrf.mxu1 }
  0xd1   : > { %v1095_v16 = vadd.f32 %v1011_v14, %v852_v29  ;;  %v1257_v10 = vpop.f32.mrf.mxu0  ;;  %v557_v25 = vadd.f32 %v556_v24, %v3155_v2  ;;  %v3315_v14 = vld [vmem:[%s2873_s29 + $0xa0] sm:$0xff] }
  0xd3   : > { %v3300_v0 = vadd.f32 %v1254_v42, %v1095_v16  ;;  %2544 = vmatmul.msk.f32.gmra.mxu1 %vm266_vm0, %v3263_v37  ;;  %2573 = vmatmul.msk.f32.gmra.mxu2 %vm266_vm0, %v3295_v59 }
  0xd4   : > { %2602 = vmatmul.msk.f32.gmra.mxu3 %vm266_vm0, %v3298_v6  ;;  %2631 = vmatmul.msk.f32.gmra.mxu0 %vm266_vm0, %v2979_v30 }
  0xd5   : > { %3946 = vst [vmem:[#allocation27_spill] sm:$0xff] %v3300_v0 }
  0xd6   : > { %v771_v29 = vpop.f32.mrf.mxu2 }
  0xd7   : > { %v853_v60 = vadd.f32 %v771_v29, %v557_v25  ;;  %v1014_v62 = vpop.f32.mrf.mxu3  ;;  %v3329_v29 = vld [vmem:[%s2873_s29 + $0x9a] sm:$0xff] }
  0xd8   : > { %v559_v16 = vpop.f32.mrf.mxu1 }
  0xd9   : > { %v1096_v42 = vadd.f32 %v1014_v62, %v853_v60  ;;  %v1260_v18 = vpop.f32.mrf.mxu0  ;;  %v560_v24 = vadd.f32 %v559_v16, %v3177_v20  ;;  %v3332_v62 = vld [vmem:[%s2873_s29 + $0xa8] sm:$0xff] }
  0xdb   : > { %v3317_v0 = vadd.f32 %v1257_v10, %v1096_v42  ;;  %2545 = vmatmul.msk.f32.gmra.mxu1 %vm266_vm0, %v3283_v12  ;;  %2574 = vmatmul.msk.f32.gmra.mxu2 %vm266_vm0, %v3312_v39 }
  0xdc   : > { %2603 = vmatmul.msk.f32.gmra.mxu3 %vm266_vm0, %v3315_v14  ;;  %2632 = vmatmul.msk.f32.gmra.mxu0 %vm266_vm0, %v2999_v34 }
  0xdd   : > { %3947 = vst [vmem:[#allocation28_spill] sm:$0xff] %v3317_v0 }
  0xde   : > { %v774_v30 = vpop.f32.mrf.mxu2 }
  0xdf   : > { %v854_v2 = vadd.f32 %v774_v30, %v560_v24  ;;  %v1017_v25 = vpop.f32.mrf.mxu3  ;;  %v3346_v30 = vld [vmem:[%s2873_s29 + $0xa2] sm:$0xff] }
  0xe0   : > { %v562_v10 = vpop.f32.mrf.mxu1 }
  0xe1   : > { %v1097_v60 = vadd.f32 %v1017_v25, %v854_v2  ;;  %v1263_v42 = vpop.f32.mrf.mxu0  ;;  %v563_v34 = vadd.f32 %v562_v10, %v3199_v38  ;;  %v3349_v25 = vld [vmem:[%s2873_s29 + $0xb0] sm:$0xff] }
  0xe3   : > { %v3334_v0 = vadd.f32 %v1260_v18, %v1097_v60  ;;  %2546 = vmatmul.msk.f32.gmra.mxu1 %vm266_vm0, %v3298_v6  ;;  %2575 = vmatmul.msk.f32.gmra.mxu2 %vm266_vm0, %v3329_v29 }
  0xe4   : > { %2604 = vmatmul.msk.f32.gmra.mxu3 %vm266_vm0, %v3332_v62  ;;  %2633 = vmatmul.msk.f32.gmra.mxu0 %vm266_vm0, %v2882_v7 }
  0xe5   : > { %3948 = vst [vmem:[#allocation29_spill] sm:$0xff] %v3334_v0 }
  0xe6   : > { %v777_v20 = vpop.f32.mrf.mxu2 }
  0xe7   : > { %v855_v16 = vadd.f32 %v777_v20, %v563_v34  ;;  %v1020_v24 = vpop.f32.mrf.mxu3  ;;  %v3363_v20 = vld [vmem:[%s2873_s29 + $0xaa] sm:$0xff] }
  0xe8   : > { %v565_v18 = vpop.f32.mrf.mxu1 }
  0xe9   : > { %v1098_v2 = vadd.f32 %v1020_v24, %v855_v16  ;;  %v1266_v60 = vpop.f32.mrf.mxu0  ;;  %v566_v7 = vadd.f32 %v565_v18, %v3221_v22  ;;  %v3366_v24 = vld [vmem:[%s2873_s29 + $0xb8] sm:$0xff] }
  0xeb   : > { %v3351_v0 = vadd.f32 %v1263_v42, %v1098_v2  ;;  %2547 = vmatmul.msk.f32.gmra.mxu1 %vm266_vm0, %v3315_v14  ;;  %2576 = vmatmul.msk.f32.gmra.mxu2 %vm266_vm0, %v3346_v30 }
  0xec   : > { %2605 = vmatmul.msk.f32.gmra.mxu3 %vm266_vm0, %v3349_v25  ;;  %2634 = vmatmul.msk.f32.gmra.mxu0 %vm266_vm0, %v2899_v11 }
  0xed   : > { %3949 = vst [vmem:[#allocation30_spill] sm:$0xff] %v3351_v0 }
  0xee   : > { %v780_v38 = vpop.f32.mrf.mxu2 }
  0xef   : > { %v856_v10 = vadd.f32 %v780_v38, %v566_v7  ;;  %v1023_v34 = vpop.f32.mrf.mxu3  ;;  %v3380_v38 = vld [vmem:[%s2873_s29 + $0xb2] sm:$0xff] }
  0xf0   : > { %v568_v42 = vpop.f32.mrf.mxu1 }
  0xf1   : > { %v1099_v16 = vadd.f32 %v1023_v34, %v856_v10  ;;  %v1269_v2 = vpop.f32.mrf.mxu0  ;;  %v569_v11 = vadd.f32 %v568_v42, %v3243_v28  ;;  %v3383_v34 = vld [vmem:[%s2873_s29 + $0xc0] sm:$0xff] }
  0xf3   : > { %v3368_v0 = vadd.f32 %v1266_v60, %v1099_v16  ;;  %2548 = vmatmul.msk.f32.gmra.mxu1 %vm266_vm0, %v3332_v62  ;;  %2577 = vmatmul.msk.f32.gmra.mxu2 %vm266_vm0, %v3363_v20 }
  0xf4   : > { %2606 = vmatmul.msk.f32.gmra.mxu3 %vm266_vm0, %v3366_v24  ;;  %2635 = vmatmul.msk.f32.gmra.mxu0 %vm266_vm0, %v2916_v15 }
  0xf5   : > { %3950 = vst [vmem:[#allocation31_spill] sm:$0xff] %v3368_v0 }
  0xf6   : > { %v783_v22 = vpop.f32.mrf.mxu2 }
  0xf7   : > { %v857_v18 = vadd.f32 %v783_v22, %v569_v11  ;;  %v1026_v7 = vpop.f32.mrf.mxu3  ;;  %v3397_v22 = vld [vmem:[%s2873_s29 + $0xba] sm:$0xff] }
  0xf8   : > { %v571_v60 = vpop.f32.mrf.mxu1 }
  0xf9   : > { %v1100_v10 = vadd.f32 %v1026_v7, %v857_v18  ;;  %v1272_v16 = vpop.f32.mrf.mxu0  ;;  %v572_v15 = vadd.f32 %v571_v60, %v3265_v1  ;;  %v3400_v7 = vld [vmem:[%s2873_s29 + $0xc8] sm:$0xff] }
  0xfb   : > { %v3385_v0 = vadd.f32 %v1269_v2, %v1100_v10  ;;  %2549 = vmatmul.msk.f32.gmra.mxu1 %vm266_vm0, %v3349_v25  ;;  %2578 = vmatmul.msk.f32.gmra.mxu2 %vm266_vm0, %v3380_v38 }
  0xfc   : > { %2607 = vmatmul.msk.f32.gmra.mxu3 %vm266_vm0, %v3383_v34  ;;  %2636 = vmatmul.msk.f32.gmra.mxu0 %vm266_vm0, %v2933_v19 }
  0xfd   : > { %3951 = vst [vmem:[#allocation32_spill] sm:$0xff] %v3385_v0 }
  0xfe   : > { %v786_v28 = vpop.f32.mrf.mxu2 }
  0xff   : > { %v858_v42 = vadd.f32 %v786_v28, %v572_v15  ;;  %v1029_v11 = vpop.f32.mrf.mxu3  ;;  %v3414_v28 = vld [vmem:[%s2873_s29 + $0xc2] sm:$0xff] }
 0x100   : > { %v574_v2 = vpop.f32.mrf.mxu1 }
 0x101   : > { %v1101_v18 = vadd.f32 %v1029_v11, %v858_v42  ;;  %v1275_v10 = vpop.f32.mrf.mxu0  ;;  %v575_v19 = vadd.f32 %v574_v2, %v3125_v57  ;;  %v3417_v11 = vld [vmem:[%s2873_s29 + $0xd0] sm:$0xff] }
 0x103   : > { %v3402_v0 = vadd.f32 %v1272_v16, %v1101_v18  ;;  %2550 = vmatmul.msk.f32.gmra.mxu1 %vm266_vm0, %v3366_v24  ;;  %2579 = vmatmul.msk.f32.gmra.mxu2 %vm266_vm0, %v3397_v22 }
 0x104   : > { %2608 = vmatmul.msk.f32.gmra.mxu3 %vm266_vm0, %v3400_v7  ;;  %2637 = vmatmul.msk.f32.gmra.mxu0 %vm266_vm0, %v2959_v26 }
 0x105   : > { %3952 = vst [vmem:[#allocation33_spill] sm:$0xff] %v3402_v0 }
 0x106   : > { %v789_v1 = vpop.f32.mrf.mxu2 }
 0x107   : > { %v859_v60 = vadd.f32 %v789_v1, %v575_v19  ;;  %v1032_v15 = vpop.f32.mrf.mxu3  ;;  %v3431_v1 = vld [vmem:[%s2873_s29 + $0xca] sm:$0xff] }
 0x108   : > { %v577_v16 = vpop.f32.mrf.mxu1  ;;  %3954 = vst [vmem:[#allocation35_spill] sm:$0xff] %v3431_v1 }
 0x109   : > { %v1102_v42 = vadd.f32 %v1032_v15, %v859_v60  ;;  %v1278_v18 = vpop.f32.mrf.mxu0  ;;  %v578_v26 = vadd.f32 %v577_v16, %v3147_v63  ;;  %v3434_v15 = vld [vmem:[%s2873_s29 + $0xd8] sm:$0xff] }
 0x10b   : > { %v3419_v0 = vadd.f32 %v1275_v10, %v1102_v42  ;;  %2551 = vmatmul.msk.f32.gmra.mxu1 %vm266_vm0, %v3383_v34  ;;  %2580 = vmatmul.msk.f32.gmra.mxu2 %vm266_vm0, %v3414_v28 }
 0x10c   : > { %2609 = vmatmul.msk.f32.gmra.mxu3 %vm266_vm0, %v3417_v11  ;;  %2638 = vmatmul.msk.f32.gmra.mxu0 %vm266_vm0, %v2982_v31 }
 0x10d   : > { %3953 = vst [vmem:[#allocation34_spill] sm:$0xff] %v3419_v0 }
 0x10e   : > { %v792_v57 = vpop.f32.mrf.mxu2 }
 0x10f   : > { %v860_v2 = vadd.f32 %v792_v57, %v578_v26  ;;  %v1035_v19 = vpop.f32.mrf.mxu3 }
 0x110   : > { %v580_v10 = vpop.f32.mrf.mxu1 }
 0x111   : > { %v1103_v60 = vadd.f32 %v1035_v19, %v860_v2  ;;  %v1281_v42 = vpop.f32.mrf.mxu0  ;;  %v581_v31 = vadd.f32 %v580_v10, %v3169_v8  ;;  %v3451_v19 = vld [vmem:[%s2873_s29 + $0xe0] sm:$0xff] }
 0x113   : > { %v3436_v0 = vadd.f32 %v1278_v18, %v1103_v60  ;;  %2552 = vmatmul.msk.f32.gmra.mxu1 %vm266_vm0, %v3400_v7  ;;  %2581 = vmatmul.msk.f32.gmra.mxu2 %vm266_vm0, %v3431_v1  ;;  %v3448_v18 = vld [vmem:[%s2873_s29 + $0xd2] sm:$0xff] }
 0x114   : > { %2610 = vmatmul.msk.f32.gmra.mxu3 %vm266_vm0, %v3434_v15  ;;  %2639 = vmatmul.msk.f32.gmra.mxu0 %vm266_vm0, %v3002_v35  ;;  %3956 = vst [vmem:[#allocation37_spill] sm:$0xff] %v3448_v18 }
 0x115   : > { %3955 = vst [vmem:[#allocation36_spill] sm:$0xff] %v3436_v0  ;;  %v3454_v0 = vld [vmem:[%s2873_s29 + $0xe1] sm:$0xff] }
 0x116   : > { %v795_v63 = vpop.f32.mrf.mxu2 }
 0x117   : > { %v861_v16 = vadd.f32 %v795_v63, %v581_v31  ;;  %v1038_v26 = vpop.f32.mrf.mxu3 }
 0x118   : > { %v583_v57 = vpop.f32.mrf.mxu1 }
 0x119   : > { %v1104_v2 = vadd.f32 %v1038_v26, %v861_v16  ;;  %v1284_v60 = vpop.f32.mrf.mxu0  ;;  %v584_v35 = vadd.f32 %v583_v57, %v3191_v23  ;;  %v3471_v26 = vld [vmem:[%s2873_s29 + $0xe8] sm:$0xff] }
 0x11b   : > { %v3456_v1 = vadd.f32 %v1281_v42, %v1104_v2  ;;  %2553 = vmatmul.msk.f32.gmra.mxu1 %vm266_vm0, %v3417_v11  ;;  %2582 = vmatmul.msk.f32.gmra.mxu2 %vm266_vm0, %v3448_v18  ;;  %v3468_v42 = vld [vmem:[%s2873_s29 + $0xda] sm:$0xff] }
 0x11c   : > { %2611 = vmatmul.msk.f32.gmra.mxu3 %vm266_vm0, %v3451_v19  ;;  %2640 = vmatmul.msk.f32.gmra.mxu0 %vm266_vm0, %v3454_v0 }
 0x11d   : > { %3957 = vst [vmem:[#allocation38_spill] sm:$0xff] %v3456_v1  ;;  %v3474_v1 = vld [vmem:[%s2873_s29 + $0xe9] sm:$0xff] }
 0x11e   : > { %v798_v8 = vpop.f32.mrf.mxu2 }
 0x11f   : > { %v862_v10 = vadd.f32 %v798_v8, %v584_v35  ;;  %v1041_v31 = vpop.f32.mrf.mxu3 }
 0x120   : > { %v586_v63 = vpop.f32.mrf.mxu1 }
 0x121   : > { %v1105_v16 = vadd.f32 %v1041_v31, %v862_v10  ;;  %v1287_v2 = vpop.f32.mrf.mxu0  ;;  %v587_v23 = vadd.f32 %v586_v63, %v3213_v40 }
 0x123   : > { %v3476_v18 = vadd.f32 %v1284_v60, %v1105_v16  ;;  %2554 = vmatmul.msk.f32.gmra.mxu1 %vm266_vm0, %v3434_v15  ;;  %2583 = vmatmul.msk.f32.gmra.mxu2 %vm266_vm0, %v3468_v42 }
 0x124   : > { %2612 = vmatmul.msk.f32.gmra.mxu3 %vm266_vm0, %v3471_v26  ;;  %2641 = vmatmul.msk.f32.gmra.mxu0 %vm266_vm0, %v3474_v1 }
 0x126   : > { %v801_v57 = vpop.f32.mrf.mxu2 }
 0x127   : > { %v863_v35 = vadd.f32 %v801_v57, %v587_v23  ;;  %v1044_v8 = vpop.f32.mrf.mxu3 }
 0x128   : > { %v589_v10 = vpop.f32.mrf.mxu1 }
 0x129   : > { %v1106_v60 = vadd.f32 %v1044_v8, %v863_v35  ;;  %v1290_v31 = vpop.f32.mrf.mxu0  ;;  %v590_v40 = vadd.f32 %v589_v10, %v3235_v4 }
 0x12b   : > { %v3487_v16 = vadd.f32 %v1287_v2, %v1106_v60  ;;  %2643 = vmatmul.msk.f32.vlgmr.msra.gmra.mxu1 %vm266_vm0, %v3030_v43  ;;  %2672 = vmatmul.msk.f32.vlgmr.msra.gmra.mxu2 %vm266_vm0, %v3033_v44 }
 0x12c   : > { %2701 = vmatmul.msk.f32.vlgmr.msra.gmra.mxu3 %vm266_vm0, %v2962_v27  ;;  %2730 = vmatmul.msk.f32.vlgmr.msra.gmra.mxu0 %vm266_vm0, %v3056_v47 }
 0x12e   : > { %v804_v63 = vpop.f32.mrf.mxu2 }
 0x12f   : > { %v864_v23 = vadd.f32 %v804_v63, %v590_v40  ;;  %v1047_v57 = vpop.f32.mrf.mxu3 }
 0x130   : > { %v592_v35 = vpop.f32.mrf.mxu1 }
 0x131   : > { %v1107_v2 = vadd.f32 %v1047_v57, %v864_v23  ;;  %v1293_v8 = vpop.f32.mrf.mxu0  ;;  %v593_v27 = vadd.f32 %v592_v35, %v3257_v41 }
 0x133   : > { %v3498_v60 = vadd.f32 %v1290_v31, %v1107_v2  ;;  %2644 = vmatmul.msk.f32.gmra.mxu1 %vm266_vm0, %v3043_v45  ;;  %2673 = vmatmul.msk.f32.gmra.mxu2 %vm266_vm0, %v3046_v46 }
 0x134   : > { %2702 = vmatmul.msk.f32.gmra.mxu3 %vm266_vm0, %v2985_v32  ;;  %2731 = vmatmul.msk.f32.gmra.mxu0 %vm266_vm0, %v3070_v49 }
 0x136   : > { %v807_v43 = vpop.f32.mrf.mxu2 }
 0x137   : > { %v865_v44 = vadd.f32 %v807_v43, %v593_v27  ;;  %v1050_v4 = vpop.f32.mrf.mxu3 }
 0x138   : > { %v595_v10 = vpop.f32.mrf.mxu1 }
 0x139   : > { %v1108_v31 = vadd.f32 %v1050_v4, %v865_v44  ;;  %v1296_v40 = vpop.f32.mrf.mxu0  ;;  %v596_v32 = vadd.f32 %v595_v10, %v3143_v61 }
 0x13b   : > { %v3509_v63 = vadd.f32 %v1293_v8, %v1108_v31  ;;  %2645 = vmatmul.msk.f32.gmra.mxu1 %vm266_vm0, %v3056_v47  ;;  %2674 = vmatmul.msk.f32.gmra.mxu2 %vm266_vm0, %v3059_v48 }
 0x13c   : > { %2703 = vmatmul.msk.f32.gmra.mxu3 %vm266_vm0, %v3005_v36  ;;  %2732 = vmatmul.msk.f32.gmra.mxu0 %vm266_vm0, %v3084_v51 }
 0x13e   : > { %v810_v45 = vpop.f32.mrf.mxu2 }
 0x13f   : > { %v866_v46 = vadd.f32 %v810_v45, %v596_v32  ;;  %v1053_v41 = vpop.f32.mrf.mxu3 }
 0x140   : > { %v598_v23 = vpop.f32.mrf.mxu1 }
 0x141   : > { %v1109_v57 = vadd.f32 %v1053_v41, %v866_v46  ;;  %v1299_v35 = vpop.f32.mrf.mxu0  ;;  %v599_v36 = vadd.f32 %v598_v23, %v3165_v3 }
 0x143   : > { %v3520_v2 = vadd.f32 %v1296_v40, %v1109_v57  ;;  %2646 = vmatmul.msk.f32.gmra.mxu1 %vm266_vm0, %v3070_v49  ;;  %2675 = vmatmul.msk.f32.gmra.mxu2 %vm266_vm0, %v3073_v50 }
 0x144   : > { %2704 = vmatmul.msk.f32.gmra.mxu3 %vm266_vm0, %v2876_v5  ;;  %2733 = vmatmul.msk.f32.gmra.mxu0 %vm266_vm0, %v3098_v53 }
 0x146   : > { %v813_v47 = vpop.f32.mrf.mxu2 }
 0x147   : > { %v867_v48 = vadd.f32 %v813_v47, %v599_v36  ;;  %v1056_v61 = vpop.f32.mrf.mxu3 }
 0x148   : > { %v601_v8 = vpop.f32.mrf.mxu1 }
 0x149   : > { %v1110_v27 = vadd.f32 %v1056_v61, %v867_v48  ;;  %v1302_v43 = vpop.f32.mrf.mxu0  ;;  %v602_v5 = vadd.f32 %v601_v8, %v3187_v21  ;;  %v3963_v61 = vld [vmem:[#allocation21_spill] sm:$0xff] }
 0x14b   : > { %v3531_v44 = vadd.f32 %v1299_v35, %v1110_v27  ;;  %2647 = vmatmul.msk.f32.gmra.mxu1 %vm266_vm0, %v3084_v51  ;;  %2676 = vmatmul.msk.f32.gmra.mxu2 %vm266_vm0, %v3087_v52 }
 0x14c   : > { %2705 = vmatmul.msk.f32.gmra.mxu3 %vm266_vm0, %v2893_v9  ;;  %2734 = vmatmul.msk.f32.gmra.mxu0 %vm266_vm0, %v3112_v55 }
 0x14e   : > { %v816_v49 = vpop.f32.mrf.mxu2 }
 0x14f   : > { %v868_v50 = vadd.f32 %v816_v49, %v602_v5  ;;  %v1059_v3 = vpop.f32.mrf.mxu3 }
 0x150   : > { %v604_v4 = vpop.f32.mrf.mxu1 }
 0x151   : > { %v1111_v10 = vadd.f32 %v1059_v3, %v868_v50  ;;  %v1305_v31 = vpop.f32.mrf.mxu0  ;;  %v605_v9 = vadd.f32 %v604_v4, %v3209_v33 }
 0x153   : > { %v3542_v40 = vadd.f32 %v1302_v43, %v1111_v10  ;;  %2648 = vmatmul.msk.f32.gmra.mxu1 %vm266_vm0, %v3098_v53  ;;  %2677 = vmatmul.msk.f32.gmra.mxu2 %vm266_vm0, %v3101_v54  ;;  %v3959_v53 = vld [vmem:[#allocation17_spill] sm:$0xff]  ;;  %v3965_v10 = vld [vmem:[#allocation3_spill] sm:$0xff] }
 0x154   : > { %2706 = vmatmul.msk.f32.gmra.mxu3 %vm266_vm0, %v2910_v13  ;;  %2735 = vmatmul.msk.f32.gmra.mxu0 %vm266_vm0, %v3128_v58  ;;  %v3958_v13 = vld [vmem:[#allocation6_spill] sm:$0xff] }
 0x156   : > { %v819_v51 = vpop.f32.mrf.mxu2 }
 0x157   : > { %v869_v52 = vadd.f32 %v819_v51, %v605_v9  ;;  %v1062_v21 = vpop.f32.mrf.mxu3  ;;  %v3967_v9 = vld [vmem:[#allocation24_spill] sm:$0xff] }
 0x158   : > { %v607_v32 = vpop.f32.mrf.mxu1 }
 0x159   : > { %v1112_v45 = vadd.f32 %v1062_v21, %v869_v52  ;;  %v1308_v46 = vpop.f32.mrf.mxu0  ;;  %v608_v54 = vadd.f32 %v607_v32, %v3959_v53  ;;  %v1861_v53 = vld [vmem:[%s2873_s29 + $0x69] sm:$0xff] }
 0x15b   : > { %v3553_v41 = vadd.f32 %v1305_v31, %v1112_v45  ;;  %2649 = vmatmul.msk.f32.gmra.mxu1 %vm266_vm0, %v3112_v55  ;;  %2678 = vmatmul.msk.f32.gmra.mxu2 %vm266_vm0, %v3115_v56  ;;  %v3960_v55 = vld [vmem:[#allocation4_spill] sm:$0xff]  ;;  %v3962_v56 = vld [vmem:[#allocation9_spill] sm:$0xff] }
 0x15c   : > { %2707 = vmatmul.msk.f32.gmra.mxu3 %vm266_vm0, %v2927_v17  ;;  %2736 = vmatmul.msk.f32.gmra.mxu0 %vm266_vm0, %v3958_v13  ;;  %v3961_v17 = vld [vmem:[#allocation2_spill] sm:$0xff]  ;;  %v3966_v31 = vld [vmem:[#allocation12_spill] sm:$0xff] }
 0x15e   : > { %v822_v33 = vpop.f32.mrf.mxu2 }
 0x15f   : > { %v870_v23 = vadd.f32 %v822_v33, %v608_v54  ;;  %v1065_v57 = vpop.f32.mrf.mxu3  ;;  %v3968_v33 = vld [vmem:[#allocation10_spill] sm:$0xff] }
 0x160   : > { %v610_v35 = vpop.f32.mrf.mxu1 }
 0x161   : > { %v1113_v36 = vadd.f32 %v1065_v57, %v870_v23  ;;  %v1311_v47 = vpop.f32.mrf.mxu0  ;;  %v611_v8 = vadd.f32 %v610_v35, %v3963_v61  ;;  %v3969_v23 = vld [vmem:[#allocation15_spill] sm:$0xff]  ;;  %v3970_v57 = vld [vmem:[#allocation5_spill] sm:$0xff] }
 0x163   : > { %v3564_v48 = vadd.f32 %v1308_v46, %v1113_v36  ;;  %2650 = vmatmul.msk.f32.gmra.mxu1 %vm266_vm0, %v3128_v58  ;;  %2679 = vmatmul.msk.f32.gmra.mxu2 %vm266_vm0, %v3960_v55  ;;  %v3964_v58 = vld [vmem:[#allocation7_spill] sm:$0xff] }
 0x164   : > { %2708 = vmatmul.msk.f32.gmra.mxu3 %vm266_vm0, %v3961_v17  ;;  %2737 = vmatmul.msk.f32.gmra.mxu0 %vm266_vm0, %v3962_v56 }
 0x166   : > { %v825_v27 = vpop.f32.mrf.mxu2 }
 0x167   : > { %v871_v43 = vadd.f32 %v825_v27, %v611_v8  ;;  %v1068_v5 = vpop.f32.mrf.mxu3  ;;  %v1862_v8 = vld [vmem:[%s2873_s29 + $0x71] sm:$0xff] }
 0x168   : > { %v613_v49 = vpop.f32.mrf.mxu1 }
 0x169   : > { %v1114_v50 = vadd.f32 %v1068_v5, %v871_v43  ;;  %v1314_v3 = vpop.f32.mrf.mxu0  ;;  %v614_v51 = vadd.f32 %v613_v49, %v3967_v9  ;;  %v3972_v5 = vld [vmem:[#allocation19_spill] sm:$0xff]  ;;  %v3973_v49 = vld [vmem:[#allocation8_spill] sm:$0xff] }
 0x16b   : > { %v3575_v4 = vadd.f32 %v1311_v47, %v1114_v50  ;;  %2651 = vmatmul.msk.f32.gmra.mxu1 %vm266_vm0, %v3958_v13  ;;  %2680 = vmatmul.msk.f32.gmra.mxu2 %vm266_vm0, %v3964_v58 }
 0x16c   : > { %2709 = vmatmul.msk.f32.gmra.mxu3 %vm266_vm0, %v3965_v10  ;;  %2738 = vmatmul.msk.f32.gmra.mxu0 %vm266_vm0, %v3966_v31 }
 0x16e   : > { %v828_v52 = vpop.f32.mrf.mxu2 }
 0x16f   : > { %v872_v21 = vadd.f32 %v828_v52, %v614_v51  ;;  %v1071_v32 = vpop.f32.mrf.mxu3  ;;  %v1863_v52 = vld [vmem:[%s2873_s29 + $0x79] sm:$0xff] }
 0x170   : > { %v616_v45 = vpop.f32.mrf.mxu1 }
 0x171   : > { %v1115_v46 = vadd.f32 %v1071_v32, %v872_v21  ;;  %v1317_v54 = vpop.f32.mrf.mxu0  ;;  %v617_v35 = vadd.f32 %v616_v45, %v3970_v57  ;;  %v3975_v45 = vld [vmem:[#allocation23_spill] sm:$0xff] }
 0x173   : > { %v3587_v13 = vadd.f32 %v1314_v3, %v1115_v46  ;;  %2652 = vmatmul.msk.f32.gmra.mxu1 %vm266_vm0, %v3962_v56  ;;  %2681 = vmatmul.msk.f32.gmra.mxu2 %vm266_vm0, %v3968_v33  ;;  %v3971_v56 = vld [vmem:[#allocation13_spill] sm:$0xff]  ;;  %v3976_v46 = vld [vmem:[#allocation11_spill] sm:$0xff] }
 0x174   : > { %2710 = vmatmul.msk.f32.gmra.mxu3 %vm266_vm0, %v1861_v53  ;;  %2739 = vmatmul.msk.f32.gmra.mxu0 %vm266_vm0, %v3969_v23 }
 0x176   : > { %v831_v36 = vpop.f32.mrf.mxu2 }
 0x177   : > { %v873_v47 = vadd.f32 %v831_v36, %v617_v35  ;;  %v1074_v55 = vpop.f32.mrf.mxu3 }
 0x178   : > { %v619_v17 = vpop.f32.mrf.mxu1 }
 0x179   : > { %v1116_v61 = vadd.f32 %v1074_v55, %v873_v47  ;;  %v1320_v27 = vpop.f32.mrf.mxu0  ;;  %v620_v50 = vadd.f32 %v619_v17, %v3973_v49  ;;  %v1864_v47 = vld [vmem:[%s2873_s29 + $0x81] sm:$0xff] }
 0x17b   : > { %v3598_v43 = vadd.f32 %v1317_v54, %v1116_v61  ;;  %2653 = vmatmul.msk.f32.gmra.mxu1 %vm266_vm0, %v3966_v31  ;;  %2682 = vmatmul.msk.f32.gmra.mxu2 %vm266_vm0, %v3971_v56  ;;  %v3974_v31 = vld [vmem:[#allocation16_spill] sm:$0xff]  ;;  %v3978_v61 = vld [vmem:[#allocation26_spill] sm:$0xff] }
 0x17c   : > { %2711 = vmatmul.msk.f32.gmra.mxu3 %vm266_vm0, %v1862_v8  ;;  %2740 = vmatmul.msk.f32.gmra.mxu0 %vm266_vm0, %v3972_v5  ;;  %v3979_v8 = vld [vmem:[#allocation14_spill] sm:$0xff] }
 0x17e   : > { %v834_v3 = vpop.f32.mrf.mxu2 }
 0x17f   : > { %v874_v58 = vadd.f32 %v834_v3, %v620_v50  ;;  %v1077_v10 = vpop.f32.mrf.mxu3 }
 0x180   : > { %v622_v9 = vpop.f32.mrf.mxu1 }
 0x181   : > { %v1117_v51 = vadd.f32 %v1077_v10, %v874_v58  ;;  %v1323_v21 = vpop.f32.mrf.mxu0  ;;  %v623_v53 = vadd.f32 %v622_v9, %v3976_v46  ;;  %v1865_v10 = vld [vmem:[%s2873_s29 + $0x89] sm:$0xff] }
 0x183   : > { %v3609_v32 = vadd.f32 %v1320_v27, %v1117_v51  ;;  %2654 = vmatmul.msk.f32.gmra.mxu1 %vm266_vm0, %v3969_v23  ;;  %2683 = vmatmul.msk.f32.gmra.mxu2 %vm266_vm0, %v3974_v31  ;;  %v3977_v23 = vld [vmem:[#allocation20_spill] sm:$0xff] }
 0x184   : > { %2712 = vmatmul.msk.f32.gmra.mxu3 %vm266_vm0, %v1863_v52  ;;  %2741 = vmatmul.msk.f32.gmra.mxu0 %vm266_vm0, %v3975_v45 }
 0x186   : > { %v837_v54 = vpop.f32.mrf.mxu2 }
 0x187   : > { %v875_v33 = vadd.f32 %v837_v54, %v623_v53  ;;  %v1080_v57 = vpop.f32.mrf.mxu3 }
 0x188   : > { %v625_v35 = vpop.f32.mrf.mxu1 }
 0x189   : > { %v1118_v36 = vadd.f32 %v1080_v57, %v875_v33  ;;  %v1326_v55 = vpop.f32.mrf.mxu0  ;;  %v626_v27 = vadd.f32 %v625_v35, %v3979_v8  ;;  %v1866_v33 = vld [vmem:[%s2873_s29 + $0x91] sm:$0xff] }
 0x18b   : > { %v3620_v17 = vadd.f32 %v1323_v21, %v1118_v36  ;;  %2655 = vmatmul.msk.f32.gmra.mxu1 %vm266_vm0, %v3972_v5  ;;  %2684 = vmatmul.msk.f32.gmra.mxu2 %vm266_vm0, %v3977_v23  ;;  %v3980_v5 = vld [vmem:[#allocation18_spill] sm:$0xff] }
 0x18c   : > { %2713 = vmatmul.msk.f32.gmra.mxu3 %vm266_vm0, %v1864_v47  ;;  %2742 = vmatmul.msk.f32.gmra.mxu0 %vm266_vm0, %v3978_v61 }
 0x18e   : > { %v840_v56 = vpop.f32.mrf.mxu2 }
 0x18f   : > { %v876_v49 = vadd.f32 %v840_v56, %v626_v27  ;;  %v1083_v50 = vpop.f32.mrf.mxu3  ;;  %v1867_v27 = vld [vmem:[%s2873_s29 + $0x99] sm:$0xff] }
 0x190   : > { %v628_v3 = vpop.f32.mrf.mxu1 }
 0x191   : > { %v1119_v58 = vadd.f32 %v1083_v50, %v876_v49  ;;  %v1329_v9 = vpop.f32.mrf.mxu0  ;;  %v629_v52 = vadd.f32 %v628_v3, %v3980_v5  ;;  %v1868_v5 = vld [vmem:[%s2873_s29 + $0xa1] sm:$0xff] }
 0x193   : > { %v3631_v51 = vadd.f32 %v1326_v55, %v1119_v58  ;;  %2656 = vmatmul.msk.f32.gmra.mxu1 %vm266_vm0, %v3975_v45  ;;  %2685 = vmatmul.msk.f32.gmra.mxu2 %vm266_vm0, %v3263_v37  ;;  %v3981_v37 = vld [vmem:[#allocation22_spill] sm:$0xff] }
 0x194   : > { %2714 = vmatmul.msk.f32.gmra.mxu3 %vm266_vm0, %v1865_v10  ;;  %2743 = vmatmul.msk.f32.gmra.mxu0 %vm266_vm0, %v3295_v59 }
 0x196   : > { %v843_v21 = vpop.f32.mrf.mxu2 }
 0x197   : > { %v877_v31 = vadd.f32 %v843_v21, %v629_v52  ;;  %v1086_v46 = vpop.f32.mrf.mxu3 }
 0x198   : > { %v631_v53 = vpop.f32.mrf.mxu1 }
 0x199   : > { %v1120_v54 = vadd.f32 %v1086_v46, %v877_v31  ;;  %v1332_v57 = vpop.f32.mrf.mxu0  ;;  %v632_v45 = vadd.f32 %v631_v53, %v3981_v37 }
 0x19b   : > { %v3642_v35 = vadd.f32 %v1329_v9, %v1120_v54  ;;  %2657 = vmatmul.msk.f32.gmra.mxu1 %vm266_vm0, %v3978_v61  ;;  %2686 = vmatmul.msk.f32.gmra.mxu2 %vm266_vm0, %v3283_v12  ;;  %v3982_v12 = vld [vmem:[#allocation25_spill] sm:$0xff] }
 0x19c   : > { %2715 = vmatmul.msk.f32.gmra.mxu3 %vm266_vm0, %v1866_v33  ;;  %2744 = vmatmul.msk.f32.gmra.mxu0 %vm266_vm0, %v3312_v39 }
 0x19e   : > { %v846_v36 = vpop.f32.mrf.mxu2 }
 0x19f   : > { %v878_v47 = vadd.f32 %v846_v36, %v632_v45  ;;  %v1089_v55 = vpop.f32.mrf.mxu3  ;;  %v3984_v45 = vld [vmem:[#allocation28_spill] sm:$0xff] }
 0x1a0   : > { %v634_v23 = vpop.f32.mrf.mxu1 }
 0x1a1   : > { %v1121_v8 = vadd.f32 %v1089_v55, %v878_v47  ;;  %v1335_v56 = vpop.f32.mrf.mxu0  ;;  %v635_v61 = vadd.f32 %v634_v23, %v3982_v12 }
 0x1a3   : > { %v3653_v49 = vadd.f32 %v1332_v57, %v1121_v8  ;;  %2658 = vmatmul.msk.f32.gmra.mxu1 %vm266_vm0, %v3295_v59  ;;  %2687 = vmatmul.msk.f32.gmra.mxu2 %vm266_vm0, %v3298_v6  ;;  %v3983_v6 = vld [vmem:[#allocation27_spill] sm:$0xff] }
 0x1a4   : > { %2716 = vmatmul.msk.f32.gmra.mxu3 %vm266_vm0, %v1867_v27  ;;  %2745 = vmatmul.msk.f32.gmra.mxu0 %vm266_vm0, %v3329_v29  ;;  %v1869_v57 = vld [vmem:[%s2873_s29 + $0xa9] sm:$0xff]  ;;  %v1870_v27 = vld [vmem:[%s2873_s29 + $0xb1] sm:$0xff] }
 0x1a6   : > { %v849_v50 = vpop.f32.mrf.mxu2 }
 0x1a7   : > { %v879_v3 = vadd.f32 %v849_v50, %v635_v61  ;;  %v1092_v58 = vpop.f32.mrf.mxu3  ;;  %v3985_v61 = vld [vmem:[#allocation29_spill] sm:$0xff] }
 0x1a8   : > { %v1497_v10 = vpop.f32.mrf.mxu1 }
 0x1a9   : > { %v1122_v9 = vadd.f32 %v1092_v58, %v879_v3  ;;  %v2226_v52 = vpop.f32.mrf.mxu0  ;;  %v1581_v21 = vadd.f32 %v1497_v10, %v3983_v6 }
 0x1ab   : > { %v3664_v59 = vadd.f32 %v1335_v56, %v1122_v9  ;;  %2659 = vmatmul.msk.f32.gmra.mxu1 %vm266_vm0, %v3312_v39  ;;  %2688 = vmatmul.msk.f32.gmra.mxu2 %vm266_vm0, %v3315_v14  ;;  %v3678_v39 = vld [vmem:[%s3893_s2] ss:$0 sm:$0xff] }
 0x1ac   : > { %2717 = vmatmul.msk.f32.gmra.mxu3 %vm266_vm0, %v1868_v5  ;;  %2746 = vmatmul.msk.f32.gmra.mxu0 %vm266_vm0, %v3346_v30 }
 0x1ae   : > { %v1740_v31 = vpop.f32.mrf.mxu2 }
 0x1af   : > { %v1824_v46 = vadd.f32 %v1740_v31, %v1581_v21  ;;  %v1983_v53 = vpop.f32.mrf.mxu3  ;;  %v3986_v21 = vld [vmem:[#allocation30_spill] sm:$0xff] }
 0x1b0   : > { %v1500_v54 = vpop.f32.mrf.mxu1 }
 0x1b1   : > { %v2067_v33 = vadd.f32 %v1983_v53, %v1824_v46  ;;  %v2229_v14 = vpop.f32.mrf.mxu0  ;;  %v1582_v36 = vadd.f32 %v1500_v54, %v3984_v45  ;;  %v3987_v45 = vld [vmem:[#allocation31_spill] sm:$0xff] }
 0x1b3   : > { %v2310_v37 = vadd.f32 %v2226_v52, %v2067_v33  ;;  %2660 = vmatmul.msk.f32.gmra.mxu1 %vm266_vm0, %v3329_v29  ;;  %2689 = vmatmul.msk.f32.gmra.mxu2 %vm266_vm0, %v3332_v62  ;;  %v1871_v52 = vld [vmem:[%s2873_s29 + $0xb9] sm:$0xff] }
 0x1b4   : > { %2718 = vmatmul.msk.f32.gmra.mxu3 %vm266_vm0, %v1869_v57  ;;  %2747 = vmatmul.msk.f32.gmra.mxu0 %vm266_vm0, %v3363_v20 }
 0x1b5   : > { %v2342_v47 = vadd.f32 %v3678_v39, %v2310_v37 }
 0x1b6   : > { %v1743_v29 = vpop.f32.mrf.mxu2 }
 0x1b7   : > { %2371 = vst.msk [vmem:[%s3688_s12] sm:$0xff] %vm2370_vm1, %v2342_v47  ;;  %v1825_v62 = vadd.f32 %v1743_v29, %v1582_v36  ;;  %v1986_v55 = vpop.f32.mrf.mxu3 }
 0x1b8   : > { %v1503_v23 = vpop.f32.mrf.mxu1 }
 0x1b9   : > { %v2068_v8 = vadd.f32 %v1986_v55, %v1825_v62  ;;  %v2232_v56 = vpop.f32.mrf.mxu0  ;;  %v1583_v50 = vadd.f32 %v1503_v23, %v3985_v61 }
 0x1bb   : > { %v2311_v12 = vadd.f32 %v2229_v14, %v2068_v8  ;;  %2661 = vmatmul.msk.f32.gmra.mxu1 %vm266_vm0, %v3346_v30  ;;  %2690 = vmatmul.msk.f32.gmra.mxu2 %vm266_vm0, %v3349_v25  ;;  %v1872_v14 = vld [vmem:[%s2873_s29 + $0xc1] sm:$0xff]  ;;  %v1873_v8 = vld [vmem:[%s2873_s29 + $0xc9] sm:$0xff] }
 0x1bc   : > { %2719 = vmatmul.msk.f32.gmra.mxu3 %vm266_vm0, %v1870_v27  ;;  %2748 = vmatmul.msk.f32.gmra.mxu0 %vm266_vm0, %v3380_v38 }
 0x1bd   : > { %v2343_v3 = vadd.f32 %v3678_v39, %v2311_v12  ;;  %v3989_v12 = vld [vmem:[#allocation32_spill] sm:$0xff] }
 0x1be   : > { %v1746_v58 = vpop.f32.mrf.mxu2 }
 0x1bf   : > { %2372 = vst.msk [vmem:[%s3688_s12 + $0x8] sm:$0xff] %vm2370_vm1, %v2343_v3  ;;  %v1826_v10 = vadd.f32 %v1746_v58, %v1583_v50  ;;  %v1989_v9 = vpop.f32.mrf.mxu3 }
 0x1c0   : > { %v1506_v5 = vpop.f32.mrf.mxu1 }
 0x1c1   : > { %v2069_v30 = vadd.f32 %v1989_v9, %v1826_v10  ;;  %v2235_v25 = vpop.f32.mrf.mxu0  ;;  %v1584_v31 = vadd.f32 %v1506_v5, %v3986_v21  ;;  %v1874_v5 = vld [vmem:[%s2873_s29 + $0xd1] sm:$0xff] }
 0x1c3   : > { %v2312_v6 = vadd.f32 %v2232_v56, %v2069_v30  ;;  %2662 = vmatmul.msk.f32.gmra.mxu1 %vm266_vm0, %v3363_v20  ;;  %2691 = vmatmul.msk.f32.gmra.mxu2 %vm266_vm0, %v3366_v24  ;;  %v3988_v56 = vld [vmem:[#allocation35_spill] sm:$0xff] }
 0x1c4   : > { %2720 = vmatmul.msk.f32.gmra.mxu3 %vm266_vm0, %v1871_v52  ;;  %2749 = vmatmul.msk.f32.gmra.mxu0 %vm266_vm0, %v3397_v22  ;;  %v3990_v52 = vld [vmem:[#allocation37_spill] sm:$0xff] }
 0x1c5   : > { %v2344_v46 = vadd.f32 %v3678_v39, %v2312_v6 }
 0x1c6   : > { %v1749_v53 = vpop.f32.mrf.mxu2 }
 0x1c7   : > { %2373 = vst.msk [vmem:[%s3688_s12 + $0x10] sm:$0xff] %vm2370_vm1, %v2344_v46  ;;  %v1827_v54 = vadd.f32 %v1749_v53, %v1584_v31  ;;  %v1992_v33 = vpop.f32.mrf.mxu3 }
 0x1c8   : > { %v1509_v57 = vpop.f32.mrf.mxu1 }
 0x1c9   : > { %v2070_v20 = vadd.f32 %v1992_v33, %v1827_v54  ;;  %v2238_v24 = vpop.f32.mrf.mxu0  ;;  %v1585_v36 = vadd.f32 %v1509_v57, %v3987_v45  ;;  %v1875_v33 = vld [vmem:[%s2873_s29 + $0xd9] sm:$0xff] }
 0x1cb   : > { %v2313_v37 = vadd.f32 %v2235_v25, %v2070_v20  ;;  %2663 = vmatmul.msk.f32.gmra.mxu1 %vm266_vm0, %v3380_v38  ;;  %2692 = vmatmul.msk.f32.gmra.mxu2 %vm266_vm0, %v3383_v34  ;;  %v3991_v25 = vld [vmem:[#allocation33_spill] sm:$0xff]  ;;  %v3992_v20 = vld [vmem:[#allocation34_spill] sm:$0xff] }
 0x1cc   : > { %2721 = vmatmul.msk.f32.gmra.mxu3 %vm266_vm0, %v1872_v14  ;;  %2750 = vmatmul.msk.f32.gmra.mxu0 %vm266_vm0, %v3414_v28 }
 0x1cd   : > { %v2345_v47 = vadd.f32 %v3678_v39, %v2313_v37 }
 0x1ce   : > { %v1752_v29 = vpop.f32.mrf.mxu2 }
 0x1cf   : > { %2374 = vst.msk [vmem:[%s3688_s12 + $0x18] sm:$0xff] %vm2370_vm1, %v2345_v47  ;;  %v1828_v62 = vadd.f32 %v1752_v29, %v1585_v36  ;;  %v1995_v55 = vpop.f32.mrf.mxu3 }
 0x1d0   : > { %v1512_v23 = vpop.f32.mrf.mxu1 }
 0x1d1   : > { %v2071_v38 = vadd.f32 %v1995_v55, %v1828_v62  ;;  %v2241_v34 = vpop.f32.mrf.mxu0  ;;  %v1586_v61 = vadd.f32 %v1512_v23, %v3989_v12  ;;  %v3993_v23 = vld [vmem:[#allocation36_spill] sm:$0xff] }
 0x1d3   : > { %v2314_v27 = vadd.f32 %v2238_v24, %v2071_v38  ;;  %2664 = vmatmul.msk.f32.gmra.mxu1 %vm266_vm0, %v3397_v22  ;;  %2693 = vmatmul.msk.f32.gmra.mxu2 %vm266_vm0, %v3400_v7 }
 0x1d4   : > { %2722 = vmatmul.msk.f32.gmra.mxu3 %vm266_vm0, %v1873_v8  ;;  %2751 = vmatmul.msk.f32.gmra.mxu0 %vm266_vm0, %v3988_v56 }
 0x1d5   : > { %v2346_v50 = vadd.f32 %v3678_v39, %v2314_v27 }
 0x1d6   : > { %v1755_v3 = vpop.f32.mrf.mxu2 }
 0x1d7   : > { %2375 = vst.msk [vmem:[%s3688_s12 + $0x20] sm:$0xff] %vm2370_vm1, %v2346_v50  ;;  %v1829_v58 = vadd.f32 %v1755_v3, %v1586_v61  ;;  %v1998_v10 = vpop.f32.mrf.mxu3 }
 0x1d8   : > { %v1515_v9 = vpop.f32.mrf.mxu1 }
 0x1d9   : > { %v2072_v22 = vadd.f32 %v1998_v10, %v1829_v58  ;;  %v2244_v7 = vpop.f32.mrf.mxu0  ;;  %v1587_v6 = vadd.f32 %v1515_v9, %v3991_v25 }
 0x1db   : > { %v2315_v30 = vadd.f32 %v2241_v34, %v2072_v22  ;;  %2665 = vmatmul.msk.f32.gmra.mxu1 %vm266_vm0, %v3414_v28  ;;  %2694 = vmatmul.msk.f32.gmra.mxu2 %vm266_vm0, %v3417_v11 }
 0x1dc   : > { %2723 = vmatmul.msk.f32.gmra.mxu3 %vm266_vm0, %v1874_v5  ;;  %2752 = vmatmul.msk.f32.gmra.mxu0 %vm266_vm0, %v3990_v52 }
 0x1dd   : > { %v2347_v21 = vadd.f32 %v3678_v39, %v2315_v30 }
 0x1de   : > { %v1758_v31 = vpop.f32.mrf.mxu2 }
 0x1df   : > { %2376 = vst.msk [vmem:[%s3688_s12 + $0x28] sm:$0xff] %vm2370_vm1, %v2347_v21  ;;  %v1830_v46 = vadd.f32 %v1758_v31, %v1587_v6  ;;  %v2001_v53 = vpop.f32.mrf.mxu3 }
 0x1e0   : > { %v1518_v54 = vpop.f32.mrf.mxu1 }
 0x1e1   : > { %v2073_v28 = vadd.f32 %v2001_v53, %v1830_v46  ;;  %v2247_v11 = vpop.f32.mrf.mxu0  ;;  %v1588_v14 = vadd.f32 %v1518_v54, %v3992_v20  ;;  %v2122_v20 = vld [vmem:[%s2873_s29 + $0xfa] sm:$0xff] }
 0x1e3   : > { %v2316_v57 = vadd.f32 %v2244_v7, %v2073_v28  ;;  %2666 = vmatmul.msk.f32.gmra.mxu1 %vm266_vm0, %v3988_v56  ;;  %2695 = vmatmul.msk.f32.gmra.mxu2 %vm266_vm0, %v3434_v15  ;;  %v2119_v15 = vld [vmem:[%s2873_s29 + $0xe2] sm:$0xff]  ;;  %v1636_v28 = vld [vmem:[%s2873_s29 + $0xf8] sm:$0xff] }
 0x1e4   : > { %2724 = vmatmul.msk.f32.gmra.mxu3 %vm266_vm0, %v1875_v33  ;;  %2753 = vmatmul.msk.f32.gmra.mxu0 %vm266_vm0, %v3468_v42 }
 0x1e5   : > { %v2348_v24 = vadd.f32 %v3678_v39, %v2316_v57 }
 0x1e6   : > { %v1761_v37 = vpop.f32.mrf.mxu2 }
 0x1e7   : > { %2377 = vst.msk [vmem:[%s3688_s12 + $0x30] sm:$0xff] %vm2370_vm1, %v2348_v24  ;;  %v1831_v45 = vadd.f32 %v1761_v37, %v1588_v14  ;;  %v2004_v36 = vpop.f32.mrf.mxu3 }
 0x1e8   : > { %v1521_v47 = vpop.f32.mrf.mxu1 }
 0x1e9   : > { %v2074_v29 = vadd.f32 %v2004_v36, %v1831_v45  ;;  %v2250_v62 = vpop.f32.mrf.mxu0  ;;  %v1589_v38 = vadd.f32 %v1521_v47, %v3993_v23 }
 0x1eb   : > { %v2317_v55 = vadd.f32 %v2247_v11, %v2074_v29  ;;  %2667 = vmatmul.msk.f32.gmra.mxu1 %vm266_vm0, %v3990_v52  ;;  %2696 = vmatmul.msk.f32.gmra.mxu2 %vm266_vm0, %v3451_v19  ;;  %v2120_v19 = vld [vmem:[%s2873_s29 + $0xea] sm:$0xff]  ;;  %v1879_v11 = vld [vmem:[%s2873_s29 + $0xf9] sm:$0xff] }
 0x1ec   : > { %2725 = vmatmul.msk.f32.gmra.mxu3 %vm266_vm0, %v3454_v0  ;;  %2754 = vmatmul.msk.f32.gmra.mxu0 %vm266_vm0, %v2119_v15  ;;  %v3994_v0 = vld [vmem:[#allocation38_spill] sm:$0xff] }
 0x1ed   : > { %v2349_v8 = vadd.f32 %v3678_v39, %v2317_v55 }
 0x1ee   : > { %v1764_v34 = vpop.f32.mrf.mxu2 }
 0x1ef   : > { %2378 = vst.msk [vmem:[%s3688_s12 + $0x38] sm:$0xff] %vm2370_vm1, %v2349_v8  ;;  %v1832_v27 = vadd.f32 %v1764_v34, %v1589_v38  ;;  %v2007_v56 = vpop.f32.mrf.mxu3 }
 0x1f0   : > { %v1524_v12 = vpop.f32.mrf.mxu1 }
 0x1f1   : > { %v2075_v61 = vadd.f32 %v2007_v56, %v1832_v27  ;;  %v2253_v50 = vpop.f32.mrf.mxu0  ;;  %v1590_v58 = vadd.f32 %v1524_v12, %v3994_v0 }
 0x1f3   : > { %v2318_v3 = vadd.f32 %v2250_v62, %v2075_v61  ;;  %2668 = vmatmul.msk.f32.gmra.mxu1 %vm266_vm0, %v3468_v42  ;;  %2697 = vmatmul.msk.f32.gmra.mxu2 %vm266_vm0, %v3471_v26  ;;  %v1635_v42 = vld [vmem:[%s2873_s29 + $0xf0] sm:$0xff] }
 0x1f4   : > { %2726 = vmatmul.msk.f32.gmra.mxu3 %vm266_vm0, %v3474_v1  ;;  %2755 = vmatmul.msk.f32.gmra.mxu0 %vm266_vm0, %v2120_v19  ;;  %v1878_v26 = vld [vmem:[%s2873_s29 + $0xf1] sm:$0xff] }
 0x1f5   : > { %v2350_v10 = vadd.f32 %v3678_v39, %v2318_v3  ;;  %v2121_v1 = vld [vmem:[%s2873_s29 + $0xf2] sm:$0xff] }
 0x1f6   : > { %v1767_v9 = vpop.f32.mrf.mxu2 }
 0x1f7   : > { %2379 = vst.msk [vmem:[%s3688_s12 + $0x40] sm:$0xff] %vm2370_vm1, %v2350_v10  ;;  %v1833_v22 = vadd.f32 %v1767_v9, %v1590_v58  ;;  %v2010_v5 = vpop.f32.mrf.mxu3 }
 0x1f8   : > { %v1527_v7 = vpop.f32.mrf.mxu1 }
 0x1f9   : > { %v2076_v30 = vadd.f32 %v2010_v5, %v1833_v22  ;;  %v2256_v52 = vpop.f32.mrf.mxu0  ;;  %v1591_v6 = vadd.f32 %v1527_v7, %v3476_v18 }
 0x1fb   : > { %v2319_v25 = vadd.f32 %v2253_v50, %v2076_v30  ;;  %2669 = vmatmul.msk.f32.gmra.mxu1 %vm266_vm0, %v2119_v15  ;;  %2698 = vmatmul.msk.f32.gmra.mxu2 %vm266_vm0, %v1635_v42 }
 0x1fc   : > { %2727 = vmatmul.msk.f32.gmra.mxu3 %vm266_vm0, %v1878_v26  ;;  %2756 = vmatmul.msk.f32.gmra.mxu0 %vm266_vm0, %v2121_v1 }
 0x1fd   : > { %v2351_v21 = vadd.f32 %v3678_v39, %v2319_v25 }
 0x1fe   : > { %v1770_v31 = vpop.f32.mrf.mxu2 }
 0x1ff   : > { %2380 = vst.msk [vmem:[%s3688_s12 + $0x48] sm:$0xff] %vm2370_vm1, %v2351_v21  ;;  %v1834_v46 = vadd.f32 %v1770_v31, %v1591_v6  ;;  %v2013_v53 = vpop.f32.mrf.mxu3 }
 0x200   : > { %v1530_v54 = vpop.f32.mrf.mxu1 }
 0x201   : > { %v2077_v33 = vadd.f32 %v2013_v53, %v1834_v46  ;;  %v2259_v57 = vpop.f32.mrf.mxu0  ;;  %v1592_v18 = vadd.f32 %v1530_v54, %v3487_v16 }
 0x203   : > { %v2320_v14 = vadd.f32 %v2256_v52, %v2077_v33  ;;  %2670 = vmatmul.msk.f32.gmra.mxu1 %vm266_vm0, %v2120_v19  ;;  %2699 = vmatmul.msk.f32.gmra.mxu2 %vm266_vm0, %v1636_v28 }
 0x204   : > { %2728 = vmatmul.msk.f32.gmra.mxu3 %vm266_vm0, %v1879_v11  ;;  %2757 = vmatmul.msk.f32.gmra.mxu0 %vm266_vm0, %v2122_v20 }
 0x205   : > { %v2352_v24 = vadd.f32 %v3678_v39, %v2320_v14 }
 0x206   : > { %v1773_v37 = vpop.f32.mrf.mxu2 }
 0x207   : > { %2381 = vst.msk [vmem:[%s3688_s12 + $0x50] sm:$0xff] %vm2370_vm1, %v2352_v24  ;;  %v1835_v45 = vadd.f32 %v1773_v37, %v1592_v18  ;;  %v2016_v36 = vpop.f32.mrf.mxu3 }
 0x208   : > { %v1533_v47 = vpop.f32.mrf.mxu1 }
 0x209   : > { %v2078_v29 = vadd.f32 %v2016_v36, %v1835_v45  ;;  %v2262_v62 = vpop.f32.mrf.mxu0  ;;  %v1593_v55 = vadd.f32 %v1533_v47, %v3498_v60 }
 0x20b   : > { %v2321_v15 = vadd.f32 %v2259_v57, %v2078_v29 }
 0x20d   : > { %v2353_v23 = vadd.f32 %v3678_v39, %v2321_v15 }
 0x20e   : > { %v1776_v38 = vpop.f32.mrf.mxu2 }
 0x20f   : > { %2382 = vst.msk [vmem:[%s3688_s12 + $0x58] sm:$0xff] %vm2370_vm1, %v2353_v23  ;;  %v1836_v16 = vadd.f32 %v1776_v38, %v1593_v55  ;;  %v2019_v8 = vpop.f32.mrf.mxu3 }
 0x210   : > { %v1536_v34 = vpop.f32.mrf.mxu1 }
 0x211   : > { %v2079_v27 = vadd.f32 %v2019_v8, %v1836_v16  ;;  %v2265_v56 = vpop.f32.mrf.mxu0  ;;  %v1594_v61 = vadd.f32 %v1536_v34, %v3509_v63 }
 0x213   : > { %v2322_v12 = vadd.f32 %v2262_v62, %v2079_v27 }
 0x215   : > { %v2354_v50 = vadd.f32 %v3678_v39, %v2322_v12 }
 0x216   : > { %v1779_v19 = vpop.f32.mrf.mxu2 }
 0x217   : > { %2383 = vst.msk [vmem:[%s3688_s12 + $0x60] sm:$0xff] %vm2370_vm1, %v2354_v50  ;;  %v1837_v60 = vadd.f32 %v1779_v19, %v1594_v61  ;;  %v2022_v3 = vpop.f32.mrf.mxu3 }
 0x218   : > { %v1539_v0 = vpop.f32.mrf.mxu1 }
 0x219   : > { %v2080_v58 = vadd.f32 %v2022_v3, %v1837_v60  ;;  %v2268_v10 = vpop.f32.mrf.mxu0  ;;  %v1595_v22 = vadd.f32 %v1539_v0, %v3520_v2 }
 0x21b   : > { %v2323_v9 = vadd.f32 %v2265_v56, %v2080_v58 }
 0x21d   : > { %v2355_v5 = vadd.f32 %v3678_v39, %v2323_v9 }
 0x21e   : > { %v1782_v7 = vpop.f32.mrf.mxu2 }
 0x21f   : > { %2384 = vst.msk [vmem:[%s3688_s12 + $0x68] sm:$0xff] %vm2370_vm1, %v2355_v5  ;;  %v1838_v63 = vadd.f32 %v1782_v7, %v1595_v22  ;;  %v2025_v42 = vpop.f32.mrf.mxu3 }
 0x220   : > { %v1542_v30 = vpop.f32.mrf.mxu1 }
 0x221   : > { %v2081_v26 = vadd.f32 %v2025_v42, %v1838_v63  ;;  %v2271_v52 = vpop.f32.mrf.mxu0  ;;  %v1596_v25 = vadd.f32 %v1542_v30, %v3531_v44 }
 0x223   : > { %v2324_v1 = vadd.f32 %v2268_v10, %v2081_v26 }
 0x225   : > { %v2356_v6 = vadd.f32 %v3678_v39, %v2324_v1 }
 0x226   : > { %v1785_v21 = vpop.f32.mrf.mxu2 }
 0x227   : > { %2385 = vst.msk [vmem:[%s3688_s12 + $0x70] sm:$0xff] %vm2370_vm1, %v2356_v6  ;;  %v1839_v2 = vadd.f32 %v1785_v21, %v1596_v25  ;;  %v2028_v31 = vpop.f32.mrf.mxu3 }
 0x228   : > { %v1545_v46 = vpop.f32.mrf.mxu1 }
 0x229   : > { %v2082_v53 = vadd.f32 %v2028_v31, %v1839_v2  ;;  %v2274_v54 = vpop.f32.mrf.mxu0  ;;  %v1597_v33 = vadd.f32 %v1545_v46, %v3542_v40 }
 0x22b   : > { %v2325_v28 = vadd.f32 %v2271_v52, %v2082_v53 }
 0x22d   : > { %v2357_v11 = vadd.f32 %v3678_v39, %v2325_v28 }
 0x22e   : > { %v1788_v57 = vpop.f32.mrf.mxu2 }
 0x22f   : > { %2386 = vst.msk [vmem:[%s3688_s12 + $0x78] sm:$0xff] %vm2370_vm1, %v2357_v11  ;;  %v1840_v44 = vadd.f32 %v1788_v57, %v1597_v33  ;;  %v2031_v20 = vpop.f32.mrf.mxu3 }
 0x230   : > { %v1548_v14 = vpop.f32.mrf.mxu1 }
 0x231   : > { %v2083_v18 = vadd.f32 %v2031_v20, %v1840_v44  ;;  %v2277_v24 = vpop.f32.mrf.mxu0  ;;  %v1598_v45 = vadd.f32 %v1548_v14, %v3553_v41 }
 0x233   : > { %v2326_v37 = vadd.f32 %v2274_v54, %v2083_v18 }
 0x235   : > { %v2358_v36 = vadd.f32 %v3678_v39, %v2326_v37 }
 0x236   : > { %v1791_v47 = vpop.f32.mrf.mxu2 }
 0x237   : > { %2387 = vst.msk [vmem:[%s3688_s12 + $0x80] sm:$0xff] %vm2370_vm1, %v2358_v36  ;;  %v1841_v40 = vadd.f32 %v1791_v47, %v1598_v45  ;;  %v2034_v29 = vpop.f32.mrf.mxu3 }
 0x238   : > { %v1551_v62 = vpop.f32.mrf.mxu1 }
 0x239   : > { %v2084_v15 = vadd.f32 %v2034_v29, %v1841_v40  ;;  %v2280_v55 = vpop.f32.mrf.mxu0  ;;  %v1599_v38 = vadd.f32 %v1551_v62, %v3564_v48 }
 0x23b   : > { %v2327_v23 = vadd.f32 %v2277_v24, %v2084_v15 }
 0x23d   : > { %v2359_v16 = vadd.f32 %v3678_v39, %v2327_v23 }
 0x23e   : > { %v1794_v8 = vpop.f32.mrf.mxu2 }
 0x23f   : > { %2388 = vst.msk [vmem:[%s3688_s12 + $0x88] sm:$0xff] %vm2370_vm1, %v2359_v16  ;;  %v1842_v41 = vadd.f32 %v1794_v8, %v1599_v38  ;;  %v2037_v34 = vpop.f32.mrf.mxu3 }
 0x240   : > { %v1554_v27 = vpop.f32.mrf.mxu1 }
 0x241   : > { %v2085_v56 = vadd.f32 %v2037_v34, %v1842_v41  ;;  %v2283_v12 = vpop.f32.mrf.mxu0  ;;  %v1600_v50 = vadd.f32 %v1554_v27, %v3575_v4 }
 0x243   : > { %v2328_v61 = vadd.f32 %v2280_v55, %v2085_v56 }
 0x245   : > { %v2360_v19 = vadd.f32 %v3678_v39, %v2328_v61 }
 0x246   : > { %v1797_v60 = vpop.f32.mrf.mxu2 }
 0x247   : > { %2389 = vst.msk [vmem:[%s3688_s12 + $0x90] sm:$0xff] %vm2370_vm1, %v2360_v19  ;;  %v1843_v48 = vadd.f32 %v1797_v60, %v1600_v50  ;;  %v2040_v3 = vpop.f32.mrf.mxu3 }
 0x248   : > { %v1557_v0 = vpop.f32.mrf.mxu1 }
 0x249   : > { %v2086_v58 = vadd.f32 %v2040_v3, %v1843_v48  ;;  %v2286_v10 = vpop.f32.mrf.mxu0  ;;  %v1601_v22 = vadd.f32 %v1557_v0, %v3587_v13 }
 0x24b   : > { %v2329_v9 = vadd.f32 %v2283_v12, %v2086_v58 }
 0x24d   : > { %v2361_v5 = vadd.f32 %v3678_v39, %v2329_v9 }
 0x24e   : > { %v1800_v7 = vpop.f32.mrf.mxu2 }
 0x24f   : > { %2390 = vst.msk [vmem:[%s3688_s12 + $0x98] sm:$0xff] %vm2370_vm1, %v2361_v5  ;;  %v1844_v4 = vadd.f32 %v1800_v7, %v1601_v22  ;;  %v2043_v63 = vpop.f32.mrf.mxu3 }
 0x250   : > { %v1560_v42 = vpop.f32.mrf.mxu1 }
 0x251   : > { %v2087_v30 = vadd.f32 %v2043_v63, %v1844_v4  ;;  %v2289_v26 = vpop.f32.mrf.mxu0  ;;  %v1602_v1 = vadd.f32 %v1560_v42, %v3598_v43 }
 0x253   : > { %v2330_v52 = vadd.f32 %v2286_v10, %v2087_v30 }
 0x255   : > { %v2362_v25 = vadd.f32 %v3678_v39, %v2330_v52 }
 0x256   : > { %v1803_v6 = vpop.f32.mrf.mxu2 }
 0x257   : > { %2391 = vst.msk [vmem:[%s3688_s12 + $0xa0] sm:$0xff] %vm2370_vm1, %v2362_v25  ;;  %v1845_v13 = vadd.f32 %v1803_v6, %v1602_v1  ;;  %v2046_v21 = vpop.f32.mrf.mxu3 }
 0x258   : > { %v1563_v2 = vpop.f32.mrf.mxu1 }
 0x259   : > { %v2088_v31 = vadd.f32 %v2046_v21, %v1845_v13  ;;  %v2292_v46 = vpop.f32.mrf.mxu0  ;;  %v1603_v54 = vadd.f32 %v1563_v2, %v3609_v32 }
 0x25b   : > { %v2331_v53 = vadd.f32 %v2289_v26, %v2088_v31 }
 0x25d   : > { %v2363_v28 = vadd.f32 %v3678_v39, %v2331_v53 }
 0x25e   : > { %v1806_v33 = vpop.f32.mrf.mxu2 }
 0x25f   : > { %2392 = vst.msk [vmem:[%s3688_s12 + $0xa8] sm:$0xff] %vm2370_vm1, %v2363_v28  ;;  %v1846_v43 = vadd.f32 %v1806_v33, %v1603_v54  ;;  %v2049_v11 = vpop.f32.mrf.mxu3 }
 0x260   : > { %v1566_v57 = vpop.f32.mrf.mxu1 }
 0x261   : > { %v2089_v44 = vadd.f32 %v2049_v11, %v1846_v43  ;;  %v2295_v20 = vpop.f32.mrf.mxu0  ;;  %v1604_v18 = vadd.f32 %v1566_v57, %v3620_v17 }
 0x263   : > { %v2332_v14 = vadd.f32 %v2292_v46, %v2089_v44 }
 0x265   : > { %v2364_v24 = vadd.f32 %v3678_v39, %v2332_v14 }
 0x266   : > { %v1809_v37 = vpop.f32.mrf.mxu2 }
 0x267   : > { %2393 = vst.msk [vmem:[%s3688_s12 + $0xb0] sm:$0xff] %vm2370_vm1, %v2364_v24  ;;  %v1847_v32 = vadd.f32 %v1809_v37, %v1604_v18  ;;  %v2052_v45 = vpop.f32.mrf.mxu3 }
 0x268   : > { %v1569_v36 = vpop.f32.mrf.mxu1 }
 0x269   : > { %v2090_v47 = vadd.f32 %v2052_v45, %v1847_v32  ;;  %v2298_v40 = vpop.f32.mrf.mxu0  ;;  %v1605_v62 = vadd.f32 %v1569_v36, %v3631_v51 }
 0x26b   : > { %v2333_v29 = vadd.f32 %v2295_v20, %v2090_v47 }
 0x26d   : > { %v2365_v15 = vadd.f32 %v3678_v39, %v2333_v29 }
 0x26e   : > { %v1812_v55 = vpop.f32.mrf.mxu2 }
 0x26f   : > { %2394 = vst.msk [vmem:[%s3688_s12 + $0xb8] sm:$0xff] %vm2370_vm1, %v2365_v15  ;;  %v1848_v17 = vadd.f32 %v1812_v55, %v1605_v62  ;;  %v2055_v23 = vpop.f32.mrf.mxu3 }
 0x270   : > { %v1572_v38 = vpop.f32.mrf.mxu1 }
 0x271   : > { %v2091_v16 = vadd.f32 %v2055_v23, %v1848_v17  ;;  %v2301_v41 = vpop.f32.mrf.mxu0  ;;  %v1606_v34 = vadd.f32 %v1572_v38, %v3642_v35 }
 0x273   : > { %v2334_v8 = vadd.f32 %v2298_v40, %v2091_v16 }
 0x275   : > { %v2366_v27 = vadd.f32 %v3678_v39, %v2334_v8 }
 0x276   : > { %v1815_v56 = vpop.f32.mrf.mxu2 }
 0x277   : > { %2395 = vst.msk [vmem:[%s3688_s12 + $0xc0] sm:$0xff] %vm2370_vm1, %v2366_v27  ;;  %v1849_v51 = vadd.f32 %v1815_v56, %v1606_v34  ;;  %v2058_v12 = vpop.f32.mrf.mxu3 }
 0x278   : > { %v1575_v61 = vpop.f32.mrf.mxu1 }
 0x279   : > { %v2092_v50 = vadd.f32 %v2058_v12, %v1849_v51  ;;  %v1607_v60 = vadd.f32 %v1575_v61, %v3653_v49  ;;  %v2304_v0 = vpop.f32.mrf.mxu0 }
 0x27b   : > { %v2335_v19 = vadd.f32 %v2301_v41, %v2092_v50 }
 0x27d   : > { %v2367_v48 = vadd.f32 %v3678_v39, %v2335_v19 }
 0x27e   : > { %v1818_v3 = vpop.f32.mrf.mxu2 }
 0x27f   : > { %2396 = vst.msk [vmem:[%s3688_s12 + $0xc8] sm:$0xff] %vm2370_vm1, %v2367_v48  ;;  %v1850_v35 = vadd.f32 %v1818_v3, %v1607_v60  ;;  %v2061_v58 = vpop.f32.mrf.mxu3 }
 0x280   : > { %v1578_v9 = vpop.f32.mrf.mxu1 }
 0x281   : > { %v2093_v10 = vadd.f32 %v2061_v58, %v1850_v35  ;;  %v1608_v5 = vadd.f32 %v1578_v9, %v3664_v59  ;;  %v2307_v42 = vpop.f32.mrf.mxu0 }
 0x283   : > { %v2336_v22 = vadd.f32 %v2304_v0, %v2093_v10 }
 0x285   : > { %v2368_v7 = vadd.f32 %v3678_v39, %v2336_v22 }
 0x286   : > { %v1821_v4 = vpop.f32.mrf.mxu2 }
 0x287   : > { %2397 = vst.msk [vmem:[%s3688_s12 + $0xd0] sm:$0xff] %vm2370_vm1, %v2368_v7  ;;  %v1851_v49 = vadd.f32 %v1821_v4, %v1608_v5  ;;  %v2064_v63 = vpop.f32.mrf.mxu3 }
 0x289   : > { %v2094_v30 = vadd.f32 %v2064_v63, %v1851_v49 }
 0x28b   : > { %v2337_v26 = vadd.f32 %v2307_v42, %v2094_v30 }
 0x28d   : > { %v2369_v52 = vadd.f32 %v3678_v39, %v2337_v26 }
 0x28f   : > { %2398 = vst.msk [vmem:[%s3688_s12 + $0xd8] sm:$0xff] %vm2370_vm1, %v2369_v52 }
 0x290 PF: > { %s13_s14 = sadd.s32 1, %s2812_s14   ;;  %s3995_s12 = smov %s2808_s13 }
 0x291   : > { %p10_p5 = scmp.ge.s32.totalorder %s13_s14, 4   ;;  %s3996_s13 = smov %s3998_s15 }
 0x293   :  { %12 = sbr.rel (!%p10_p5) target bundleno = 2 (0x2), region = 70 }

</bundles_post_ra>
